<compile_context>
chip_gen: v6e
topology: v6e:2x2x1
jax: 0.10.0
libtpu: 0.0.40
codegen_flags: <defaults>
</compile_context>

<pallas_src>
import functools

import jax
import jax.numpy as jnp
from jax.experimental import pallas as pl
from jax.experimental.pallas import tpu as pltpu

# ----------------------------- config (small) ------------------------------
VOCAB = 128
HIDDEN = 32
LAYERS = 2
HEADS = 4
HEAD_DIM = HIDDEN // HEADS
INTER = 64
MAX_POS = 16
LN_EPS = 1e-12

# ------------------- packed "small params" row layout ----------------------
ROWS_PER_LAYER = 16          # 8-aligned per-layer stride
R_BQKV = 0                   # rows +0..+3 : per-head [bq|bk|bv] (24 lanes)
R_BO = 4
R_LN1_G = 5
R_LN1_B = 6
R_BFF1 = 7
R_BFF2 = 8
R_LN2_G = 9
R_LN2_B = 10
SHARED_BASE = LAYERS * ROWS_PER_LAYER
R_LN_G = SHARED_BASE + 0     # shared LN (embedding LN == pre-head LN)
R_LN_B = SHARED_BASE + 1
R_MLM_B = SHARED_BASE + 2
SMALL_ROWS = SHARED_BASE + 8


# ------------------------- in-kernel helper functions -----------------------
def _gelu_exact(x):
    # exact GELU (matches nn.GELU() default): 0.5*x*(1+erf(x/sqrt(2)))
    return 0.5 * x * (1.0 + jax.lax.erf(x * jnp.float32(0.7071067811865476)))


def _layernorm(x, g, b):
    mean = jnp.mean(x, axis=-1, keepdims=True)
    var = jnp.mean(jnp.square(x - mean), axis=-1, keepdims=True)
    return (x - mean) * jax.lax.rsqrt(var + LN_EPS) * g + b


# ------------------------------ fused kernel --------------------------------
def _fused_forward_kernel(ids_ref, small_ref, emb_ref, wqkv_ref, wo_ref,
                          wff_ref, mlm_ref, out_ref, *, seq_len):
    f32, bf16 = jnp.float32, jnp.bfloat16
    S = seq_len

    small = small_ref[...]                                   # [SMALL_ROWS,128] f32

    def row(r, n):
        return small[r:r + 1, 0:n]                           # [1, n] f32

    # ---- embeddings: in-kernel one-hot word lookup + position rows ----
    emb = emb_ref[...]                                       # [VOCAB+MAX_POS, H] bf16
    vocab_iota = jax.lax.broadcasted_iota(jnp.int32, (S, VOCAB), 1)
    onehot = (ids_ref[...] == vocab_iota).astype(bf16)       # [S, VOCAB]
    word = jnp.dot(onehot, emb[0:VOCAB, :], preferred_element_type=f32)
    pos = emb[VOCAB:VOCAB + S, :].astype(f32)                # position ids 0..S-1
    x = _layernorm(word + pos, row(R_LN_G, HIDDEN), row(R_LN_B, HIDDEN))

    for li in range(LAYERS):                                 # static unroll
        base = li * ROWS_PER_LAYER
        wqkv_l = wqkv_ref[li]                                # [HEADS, H, 3*Dh] bf16
        wo_l = wo_ref[li]                                    # [HEADS, Dh, H]   bf16
        wff_l = wff_ref[li]                                  # [H+INTER, INTER] bf16
        bqkv_l = small[base + R_BQKV:base + R_BQKV + HEADS, 0:3 * HEAD_DIM]

        # --- per-head batched QKV projection (1/sqrt(Dh) folded into Q) ---
        x_b = jnp.broadcast_to(x.astype(bf16), (HEADS, S, HIDDEN))
        qkv = jnp.einsum('hsk,hkd->hsd', x_b, wqkv_l,
                         preferred_element_type=f32)         # [HEADS, S, 3*Dh]
        qkv = qkv + bqkv_l[:, None, :]
        q = qkv[:, :, 0:HEAD_DIM].astype(bf16)
        k = qkv[:, :, HEAD_DIM:2 * HEAD_DIM].astype(bf16)
        v = qkv[:, :, 2 * HEAD_DIM:3 * HEAD_DIM].astype(bf16)

        # --- attention, all heads batched (per-batch grid => no mask needed) ---
        s = jnp.einsum('hqd,hkd->hqk', q, k, preferred_element_type=f32)
        m = jnp.max(s, axis=-1, keepdims=True)
        p = jnp.exp(s - m)
        denom = jnp.sum(p, axis=-1, keepdims=True)
        p = (p * pl.reciprocal(denom, approx=True)).astype(bf16)
        ctx = jnp.einsum('hqk,hkd->hqd', p, v,
                         preferred_element_type=f32)         # [HEADS, S, Dh]

        # --- output projection: one batched matmul + head-sum ---
        attn_h = jnp.einsum('hsd,hdk->hsk', ctx.astype(bf16), wo_l,
                            preferred_element_type=f32)      # [HEADS, S, H]
        attn = jnp.sum(attn_h, axis=0) + row(base + R_BO, HIDDEN)
        x = _layernorm(x + attn, row(base + R_LN1_G, HIDDEN),
                       row(base + R_LN1_B, HIDDEN))

        # --- feed-forward ---
        h1 = jnp.dot(x.astype(bf16), wff_l[0:HIDDEN, :],
                     preferred_element_type=f32) + row(base + R_BFF1, INTER)
        h1 = _gelu_exact(h1)
        h2 = jnp.dot(h1.astype(bf16), wff_l[HIDDEN:HIDDEN + INTER, 0:HIDDEN],
                     preferred_element_type=f32) + row(base + R_BFF2, HIDDEN)
        x = _layernorm(x + h2, row(base + R_LN2_G, HIDDEN),
                       row(base + R_LN2_B, HIDDEN))

    # mlm_logits = mlm_head(GELU(LayerNorm(hidden)))  -- shared LN params
    x = _gelu_exact(_layernorm(x, row(R_LN_G, HIDDEN), row(R_LN_B, HIDDEN)))
    out_ref[...] = (jnp.dot(x.astype(bf16), mlm_ref[...],
                            preferred_element_type=f32)
                    + row(R_MLM_B, VOCAB))


# ------------------------------ params / packing ----------------------------
def init_params(key):
    std = 0.02
    keys = jax.random.split(key, 3 + LAYERS)

    word_emb = std * jax.random.normal(keys[0], (VOCAB, HIDDEN), jnp.float32)
    pos_emb = std * jax.random.normal(keys[1], (MAX_POS, HIDDEN), jnp.float32)
    mlm_w = std * jax.random.normal(keys[2], (HIDDEN, VOCAB), jnp.float32)
    mlm_b = jnp.zeros((VOCAB,), jnp.float32)

    small = jnp.zeros((SMALL_ROWS, 128), jnp.float32)
    small = small.at[R_LN_G, 0:HIDDEN].set(1.0)          # shared LN gamma
    small = small.at[R_MLM_B, 0:VOCAB].set(mlm_b)        # (betas stay zero)

    scale = 1.0 / (HEAD_DIM ** 0.5)
    wqkv_layers, wo_layers, wff_layers = [], [], []
    for li in range(LAYERS):
        lk = jax.random.split(keys[3 + li], 12)
        wq = std * jax.random.normal(lk[0], (HIDDEN, HIDDEN), jnp.float32) * scale
        bq = std * jax.random.normal(lk[1], (HIDDEN,), jnp.float32) * scale
        wk = std * jax.random.normal(lk[2], (HIDDEN, HIDDEN), jnp.float32)
        bk = std * jax.random.normal(lk[3], (HIDDEN,), jnp.float32)
        wv = std * jax.random.normal(lk[4], (HIDDEN, HIDDEN), jnp.float32)
        bv = std * jax.random.normal(lk[5], (HIDDEN,), jnp.float32)
        wo = std * jax.random.normal(lk[6], (HIDDEN, HIDDEN), jnp.float32)
        bo = std * jax.random.normal(lk[7], (HIDDEN,), jnp.float32)
        wff1 = std * jax.random.normal(lk[8], (HIDDEN, INTER), jnp.float32)
        bff1 = std * jax.random.normal(lk[9], (INTER,), jnp.float32)
        wff2 = std * jax.random.normal(lk[10], (INTER, HIDDEN), jnp.float32)
        bff2 = std * jax.random.normal(lk[11], (HIDDEN,), jnp.float32)

        # per-head fused QKV weight [HEADS, HIDDEN, 3*Dh] (Q scale folded in)
        heads_w, heads_b = [], []
        for h in range(HEADS):
            sl = slice(h * HEAD_DIM, (h + 1) * HEAD_DIM)
            heads_w.append(jnp.concatenate([wq[:, sl], wk[:, sl], wv[:, sl]], axis=1))
            heads_b.append(jnp.concatenate([bq[sl], bk[sl], bv[sl]]))
        wqkv_layers.append(jnp.stack(heads_w))                       # [HEADS,H,3Dh]
        wo_layers.append(jnp.stack(
            [wo[h * HEAD_DIM:(h + 1) * HEAD_DIM, :] for h in range(HEADS)]))

        blk = jnp.zeros((HIDDEN + INTER, INTER), jnp.float32)
        blk = blk.at[0:HIDDEN, :].set(wff1)
        blk = blk.at[HIDDEN:, 0:HIDDEN].set(wff2)
        wff_layers.append(blk)

        base = li * ROWS_PER_LAYER
        for h in range(HEADS):
            small = small.at[base + R_BQKV + h, 0:3 * HEAD_DIM].set(heads_b[h])
        small = small.at[base + R_BO, 0:HIDDEN].set(bo)
        small = small.at[base + R_LN1_G, 0:HIDDEN].set(1.0)
        small = small.at[base + R_BFF1, 0:INTER].set(bff1)
        small = small.at[base + R_BFF2, 0:HIDDEN].set(bff2)
        small = small.at[base + R_LN2_G, 0:HIDDEN].set(1.0)
        # ln1_b / ln2_b rows stay zero (PyTorch LayerNorm default)

    return {
        "small": small,                                                   # f32
        "emb": jnp.concatenate([word_emb, pos_emb], axis=0).astype(jnp.bfloat16),
        "wqkv": jnp.stack(wqkv_layers).astype(jnp.bfloat16),             # [L,HEADS,H,3Dh]
        "wo": jnp.stack(wo_layers).astype(jnp.bfloat16),                 # [L,HEADS,Dh,H]
        "wff": jnp.stack(wff_layers).astype(jnp.bfloat16),               # [L,H+INTER,INTER]
        "mlm_w": mlm_w.astype(jnp.bfloat16),                             # [H,VOCAB]
    }


def _resident_spec(arr):
    ndim = arr.ndim
    return pl.BlockSpec(arr.shape, lambda b, _n=ndim: (0,) * _n)


# ------------------------------ model wrapper -------------------------------
def distilbert_mlm_forward(params, input_ids):
    B, S = input_ids.shape
    assert S <= MAX_POS, "sequence length exceeds max_position_embeddings"
    M = B * S
    ids = input_ids.reshape(M, 1).astype(jnp.int32)

    kernel = functools.partial(_fused_forward_kernel, seq_len=S)
    logits = pl.pallas_call(
        kernel,
        out_shape=jax.ShapeDtypeStruct((M, VOCAB), jnp.float32),
        grid=(B,),
        in_specs=[
            pl.BlockSpec((S, 1), lambda b: (b, 0)),      # token ids (per batch)
            _resident_spec(params["small"]),
            _resident_spec(params["emb"]),
            _resident_spec(params["wqkv"]),
            _resident_spec(params["wo"]),
            _resident_spec(params["wff"]),
            _resident_spec(params["mlm_w"]),
        ],
        out_specs=pl.BlockSpec((S, VOCAB), lambda b: (b, 0)),
        compiler_params=pltpu.CompilerParams(
            dimension_semantics=("parallel",)),
    )(ids, params["small"], params["emb"], params["wqkv"],
      params["wo"], params["wff"], params["mlm_w"])
    return logits.reshape(B, S, VOCAB)


if __name__ == "__main__":
    key = jax.random.PRNGKey(0)
    k_ids, k_params = jax.random.split(key)

    B, S = 2, 8
    input_ids = jax.random.randint(k_ids, (B, S), 0, VOCAB, dtype=jnp.int32)
    params = init_params(k_params)

    fwd = jax.jit(distilbert_mlm_forward)
    logits = jax.block_until_ready(fwd(params, input_ids))

    assert logits.shape == (B, S, VOCAB), logits.shape
    assert bool(jnp.all(jnp.isfinite(logits)))
    print("KERNEL_OK")
</pallas_src>

<mosaic_0001>
module attributes {stable_mosaic.version = 11 : i64} {
  func.func @_fused_forward_kernel(%arg0: i32, %arg1: memref<8x1xi32, #tpu.memory_space<vmem>>, %arg2: memref<40x128xf32, #tpu.memory_space<vmem>>, %arg3: memref<144x32xbf16, #tpu.memory_space<vmem>>, %arg4: memref<2x4x32x24xbf16, #tpu.memory_space<vmem>>, %arg5: memref<2x4x8x32xbf16, #tpu.memory_space<vmem>>, %arg6: memref<2x96x64xbf16, #tpu.memory_space<vmem>>, %arg7: memref<32x128xbf16, #tpu.memory_space<vmem>>, %arg8: memref<8x128xf32, #tpu.memory_space<vmem>>) attributes {dimension_semantics = [#tpu.dimension_semantics<parallel>], iteration_bounds = array<i64: 2>, scalar_prefetch = 0 : i64, scratch_operands = 0 : i64, tpu.core_type = #tpu.core_type<tc>, window_params = [{transform_indices = @transform_0, window_bounds = array<i64: 8, 1>}, {pipeline_mode = #tpu.pipeline_mode<synchronous>, transform_indices = @transform_1, window_bounds = array<i64: 40, 128>}, {pipeline_mode = #tpu.pipeline_mode<synchronous>, transform_indices = @transform_2, window_bounds = array<i64: 144, 32>}, {pipeline_mode = #tpu.pipeline_mode<synchronous>, transform_indices = @transform_3, window_bounds = array<i64: 2, 4, 32, 24>}, {pipeline_mode = #tpu.pipeline_mode<synchronous>, transform_indices = @transform_4, window_bounds = array<i64: 2, 4, 8, 32>}, {pipeline_mode = #tpu.pipeline_mode<synchronous>, transform_indices = @transform_5, window_bounds = array<i64: 2, 96, 64>}, {pipeline_mode = #tpu.pipeline_mode<synchronous>, transform_indices = @transform_6, window_bounds = array<i64: 32, 128>}, {transform_indices = @transform_7, window_bounds = array<i64: 8, 128>}]} {
    %c0 = arith.constant 0 : index
    %c0_0 = arith.constant 0 : index
    %0 = vector.load %arg2[%c0, %c0_0] : memref<40x128xf32, #tpu.memory_space<vmem>>, vector<40x128xf32>
    %c0_1 = arith.constant 0 : index
    %c0_2 = arith.constant 0 : index
    %1 = vector.load %arg3[%c0_1, %c0_2] : memref<144x32xbf16, #tpu.memory_space<vmem>>, vector<144x32xbf16>
    %2 = tpu.iota {dimensions = array<i32: 1>} : vector<8x128xi32>
    %c0_3 = arith.constant 0 : index
    %c0_4 = arith.constant 0 : index
    %3 = vector.load %arg1[%c0_3, %c0_4] : memref<8x1xi32, #tpu.memory_space<vmem>>, vector<8x1xi32>
    %4 = vector.broadcast %3 : vector<8x1xi32> to vector<8x128xi32>
    %5 = arith.cmpi eq, %4, %2 : vector<8x128xi32>
    %6 = arith.extui %5 : vector<8x128xi1> to vector<8x128xi32>
    %7 = arith.sitofp %6 : vector<8x128xi32> to vector<8x128xf32>
    %8 = arith.truncf %7 : vector<8x128xf32> to vector<8x128xbf16>
    %9 = vector.extract_strided_slice %1 {offsets = [0, 0], sizes = [128, 32], strides = [1, 1]} : vector<144x32xbf16> to vector<128x32xbf16>
    %cst = arith.constant dense<0.000000e+00> : vector<8x32xf32>
    %10 = tpu.matmul %8, %9, %cst {dimension_numbers = #tpu.dot_dimension_numbers<[1], [0], [0], [1], [0, 0, 1, 1], [], []>} : vector<8x128xbf16>, vector<128x32xbf16>, vector<8x32xf32> -> vector<8x32xf32>
    %11 = vector.extract_strided_slice %1 {offsets = [128, 0], sizes = [8, 32], strides = [1, 1]} : vector<144x32xbf16> to vector<8x32xbf16>
    %12 = arith.extf %11 : vector<8x32xbf16> to vector<8x32xf32>
    %13 = arith.addf %10, %12 : vector<8x32xf32>
    %14 = vector.extract_strided_slice %0 {offsets = [32, 0], sizes = [1, 32], strides = [1, 1]} : vector<40x128xf32> to vector<1x32xf32>
    %15 = vector.extract_strided_slice %0 {offsets = [33, 0], sizes = [1, 32], strides = [1, 1]} : vector<40x128xf32> to vector<1x32xf32>
    %cst_5 = arith.constant dense<0.000000e+00> : vector<8xf32>
    %16 = vector.multi_reduction <add>, %13, %cst_5 [1] : vector<8x32xf32> to vector<8xf32>
    %17 = vector.shape_cast %16 : vector<8xf32> to vector<8x1xf32>
    %cst_6 = arith.constant 3.200000e+01 : f32
    %18 = vector.broadcast %cst_6 : f32 to vector<8x1xf32>
    %19 = arith.divf %17, %18 : vector<8x1xf32>
    %20 = vector.broadcast %19 : vector<8x1xf32> to vector<8x32xf32>
    %21 = arith.subf %13, %20 : vector<8x32xf32>
    %22 = arith.mulf %21, %21 : vector<8x32xf32>
    %cst_7 = arith.constant dense<0.000000e+00> : vector<8xf32>
    %23 = vector.multi_reduction <add>, %22, %cst_7 [1] : vector<8x32xf32> to vector<8xf32>
    %24 = vector.shape_cast %23 : vector<8xf32> to vector<8x1xf32>
    %cst_8 = arith.constant 3.200000e+01 : f32
    %25 = vector.broadcast %cst_8 : f32 to vector<8x1xf32>
    %26 = arith.divf %24, %25 : vector<8x1xf32>
    %27 = vector.broadcast %19 : vector<8x1xf32> to vector<8x32xf32>
    %28 = arith.subf %13, %27 : vector<8x32xf32>
    %cst_9 = arith.constant 9.99999996E-13 : f32
    %29 = vector.broadcast %cst_9 : f32 to vector<8x1xf32>
    %30 = arith.addf %26, %29 : vector<8x1xf32>
    %31 = math.rsqrt %30 : vector<8x1xf32>
    %32 = vector.broadcast %31 : vector<8x1xf32> to vector<8x32xf32>
    %33 = arith.mulf %28, %32 : vector<8x32xf32>
    %34 = vector.broadcast %14 : vector<1x32xf32> to vector<8x32xf32>
    %35 = arith.mulf %33, %34 : vector<8x32xf32>
    %36 = vector.broadcast %15 : vector<1x32xf32> to vector<8x32xf32>
    %37 = arith.addf %35, %36 : vector<8x32xf32>
    %c0_10 = arith.constant 0 : index
    %c0_11 = arith.constant 0 : index
    %c0_12 = arith.constant 0 : index
    %c0_13 = arith.constant 0 : index
    %38 = vector.load %arg4[%c0_10, %c0_11, %c0_12, %c0_13] : memref<2x4x32x24xbf16, #tpu.memory_space<vmem>>, vector<1x4x32x24xbf16>
    %39 = vector.shape_cast %38 : vector<1x4x32x24xbf16> to vector<4x32x24xbf16>
    %c0_14 = arith.constant 0 : index
    %c0_15 = arith.constant 0 : index
    %c0_16 = arith.constant 0 : index
    %c0_17 = arith.constant 0 : index
    %40 = vector.load %arg5[%c0_14, %c0_15, %c0_16, %c0_17] : memref<2x4x8x32xbf16, #tpu.memory_space<vmem>>, vector<1x4x8x32xbf16>
    %41 = vector.shape_cast %40 : vector<1x4x8x32xbf16> to vector<4x8x32xbf16>
    %c0_18 = arith.constant 0 : index
    %c0_19 = arith.constant 0 : index
    %c0_20 = arith.constant 0 : index
    %42 = vector.load %arg6[%c0_18, %c0_19, %c0_20] : memref<2x96x64xbf16, #tpu.memory_space<vmem>>, vector<1x96x64xbf16>
    %43 = vector.shape_cast %42 : vector<1x96x64xbf16> to vector<96x64xbf16>
    %44 = vector.extract_strided_slice %0 {offsets = [0, 0], sizes = [4, 24], strides = [1, 1]} : vector<40x128xf32> to vector<4x24xf32>
    %45 = arith.truncf %37 : vector<8x32xf32> to vector<8x32xbf16>
    %46 = vector.shape_cast %45 : vector<8x32xbf16> to vector<1x8x32xbf16>
    %47 = vector.broadcast %46 : vector<1x8x32xbf16> to vector<4x8x32xbf16>
    "tpu.trace_start"() <{level = 10 : i32, message = "hsk,hkd->hsd"}> : () -> ()
    %cst_21 = arith.constant dense<0.000000e+00> : vector<4x8x24xf32>
    %48 = tpu.matmul %47, %39, %cst_21 {dimension_numbers = #tpu.dot_dimension_numbers<[2], [1], [1], [2], [0, 0, 0, 1, 1, 2], [0], [0]>} : vector<4x8x32xbf16>, vector<4x32x24xbf16>, vector<4x8x24xf32> -> vector<4x8x24xf32>
    "tpu.trace_stop"() : () -> ()
    %49 = vector.shape_cast %44 : vector<4x24xf32> to vector<4x1x24xf32>
    %50 = vector.broadcast %49 : vector<4x1x24xf32> to vector<4x8x24xf32>
    %51 = arith.addf %48, %50 : vector<4x8x24xf32>
    %52 = vector.extract_strided_slice %51 {offsets = [0, 0, 0], sizes = [4, 8, 8], strides = [1, 1, 1]} : vector<4x8x24xf32> to vector<4x8x8xf32>
    %53 = arith.truncf %52 : vector<4x8x8xf32> to vector<4x8x8xbf16>
    %54 = vector.extract_strided_slice %51 {offsets = [0, 0, 8], sizes = [4, 8, 8], strides = [1, 1, 1]} : vector<4x8x24xf32> to vector<4x8x8xf32>
    %55 = arith.truncf %54 : vector<4x8x8xf32> to vector<4x8x8xbf16>
    %56 = vector.extract_strided_slice %51 {offsets = [0, 0, 16], sizes = [4, 8, 8], strides = [1, 1, 1]} : vector<4x8x24xf32> to vector<4x8x8xf32>
    %57 = arith.truncf %56 : vector<4x8x8xf32> to vector<4x8x8xbf16>
    "tpu.trace_start"() <{level = 10 : i32, message = "hqd,hkd->hqk"}> : () -> ()
    %cst_22 = arith.constant dense<0.000000e+00> : vector<4x8x8xf32>
    %58 = tpu.matmul %53, %55, %cst_22 {dimension_numbers = #tpu.dot_dimension_numbers<[2], [2], [1], [1], [0, 0, 0, 1, 1, 1], [0], [0]>} : vector<4x8x8xbf16>, vector<4x8x8xbf16>, vector<4x8x8xf32> -> vector<4x8x8xf32>
    "tpu.trace_stop"() : () -> ()
    %cst_23 = arith.constant dense<0xFF800000> : vector<4x8xf32>
    %59 = vector.multi_reduction <maximumf>, %58, %cst_23 [2] : vector<4x8x8xf32> to vector<4x8xf32>
    %60 = vector.shape_cast %59 : vector<4x8xf32> to vector<4x8x1xf32>
    %61 = vector.broadcast %60 : vector<4x8x1xf32> to vector<4x8x8xf32>
    %62 = arith.subf %58, %61 : vector<4x8x8xf32>
    %63 = math.exp %62 : vector<4x8x8xf32>
    %cst_24 = arith.constant dense<0.000000e+00> : vector<4x8xf32>
    %64 = vector.multi_reduction <add>, %63, %cst_24 [2] : vector<4x8x8xf32> to vector<4x8xf32>
    %65 = vector.shape_cast %64 : vector<4x8xf32> to vector<4x8x1xf32>
    %66 = tpu.reciprocal %65 {approx = true} : vector<4x8x1xf32> -> vector<4x8x1xf32>
    %67 = vector.broadcast %66 : vector<4x8x1xf32> to vector<4x8x8xf32>
    %68 = arith.mulf %63, %67 : vector<4x8x8xf32>
    %69 = arith.truncf %68 : vector<4x8x8xf32> to vector<4x8x8xbf16>
    "tpu.trace_start"() <{level = 10 : i32, message = "hqk,hkd->hqd"}> : () -> ()
    %cst_25 = arith.constant dense<0.000000e+00> : vector<4x8x8xf32>
    %70 = tpu.matmul %69, %57, %cst_25 {dimension_numbers = #tpu.dot_dimension_numbers<[2], [1], [1], [2], [0, 0, 0, 1, 1, 2], [0], [0]>} : vector<4x8x8xbf16>, vector<4x8x8xbf16>, vector<4x8x8xf32> -> vector<4x8x8xf32>
    "tpu.trace_stop"() : () -> ()
    %71 = arith.truncf %70 : vector<4x8x8xf32> to vector<4x8x8xbf16>
    "tpu.trace_start"() <{level = 10 : i32, message = "hsd,hdk->hsk"}> : () -> ()
    %cst_26 = arith.constant dense<0.000000e+00> : vector<4x8x32xf32>
    %72 = tpu.matmul %71, %41, %cst_26 {dimension_numbers = #tpu.dot_dimension_numbers<[2], [1], [1], [2], [0, 0, 0, 1, 1, 2], [0], [0]>} : vector<4x8x8xbf16>, vector<4x8x32xbf16>, vector<4x8x32xf32> -> vector<4x8x32xf32>
    "tpu.trace_stop"() : () -> ()
    %cst_27 = arith.constant dense<0.000000e+00> : vector<8x32xf32>
    %73 = vector.multi_reduction <add>, %72, %cst_27 [0] : vector<4x8x32xf32> to vector<8x32xf32>
    %74 = vector.extract_strided_slice %0 {offsets = [4, 0], sizes = [1, 32], strides = [1, 1]} : vector<40x128xf32> to vector<1x32xf32>
    %75 = vector.broadcast %74 : vector<1x32xf32> to vector<8x32xf32>
    %76 = arith.addf %73, %75 : vector<8x32xf32>
    %77 = arith.addf %37, %76 : vector<8x32xf32>
    %78 = vector.extract_strided_slice %0 {offsets = [5, 0], sizes = [1, 32], strides = [1, 1]} : vector<40x128xf32> to vector<1x32xf32>
    %79 = vector.extract_strided_slice %0 {offsets = [6, 0], sizes = [1, 32], strides = [1, 1]} : vector<40x128xf32> to vector<1x32xf32>
    %cst_28 = arith.constant dense<0.000000e+00> : vector<8xf32>
    %80 = vector.multi_reduction <add>, %77, %cst_28 [1] : vector<8x32xf32> to vector<8xf32>
    %81 = vector.shape_cast %80 : vector<8xf32> to vector<8x1xf32>
    %cst_29 = arith.constant 3.200000e+01 : f32
    %82 = vector.broadcast %cst_29 : f32 to vector<8x1xf32>
    %83 = arith.divf %81, %82 : vector<8x1xf32>
    %84 = vector.broadcast %83 : vector<8x1xf32> to vector<8x32xf32>
    %85 = arith.subf %77, %84 : vector<8x32xf32>
    %86 = arith.mulf %85, %85 : vector<8x32xf32>
    %cst_30 = arith.constant dense<0.000000e+00> : vector<8xf32>
    %87 = vector.multi_reduction <add>, %86, %cst_30 [1] : vector<8x32xf32> to vector<8xf32>
    %88 = vector.shape_cast %87 : vector<8xf32> to vector<8x1xf32>
    %cst_31 = arith.constant 3.200000e+01 : f32
    %89 = vector.broadcast %cst_31 : f32 to vector<8x1xf32>
    %90 = arith.divf %88, %89 : vector<8x1xf32>
    %91 = vector.broadcast %83 : vector<8x1xf32> to vector<8x32xf32>
    %92 = arith.subf %77, %91 : vector<8x32xf32>
    %cst_32 = arith.constant 9.99999996E-13 : f32
    %93 = vector.broadcast %cst_32 : f32 to vector<8x1xf32>
    %94 = arith.addf %90, %93 : vector<8x1xf32>
    %95 = math.rsqrt %94 : vector<8x1xf32>
    %96 = vector.broadcast %95 : vector<8x1xf32> to vector<8x32xf32>
    %97 = arith.mulf %92, %96 : vector<8x32xf32>
    %98 = vector.broadcast %78 : vector<1x32xf32> to vector<8x32xf32>
    %99 = arith.mulf %97, %98 : vector<8x32xf32>
    %100 = vector.broadcast %79 : vector<1x32xf32> to vector<8x32xf32>
    %101 = arith.addf %99, %100 : vector<8x32xf32>
    %102 = arith.truncf %101 : vector<8x32xf32> to vector<8x32xbf16>
    %103 = vector.extract_strided_slice %43 {offsets = [0, 0], sizes = [32, 64], strides = [1, 1]} : vector<96x64xbf16> to vector<32x64xbf16>
    %cst_33 = arith.constant dense<0.000000e+00> : vector<8x64xf32>
    %104 = tpu.matmul %102, %103, %cst_33 {dimension_numbers = #tpu.dot_dimension_numbers<[1], [0], [0], [1], [0, 0, 1, 1], [], []>} : vector<8x32xbf16>, vector<32x64xbf16>, vector<8x64xf32> -> vector<8x64xf32>
    %105 = vector.extract_strided_slice %0 {offsets = [7, 0], sizes = [1, 64], strides = [1, 1]} : vector<40x128xf32> to vector<1x64xf32>
    %106 = vector.broadcast %105 : vector<1x64xf32> to vector<8x64xf32>
    %107 = arith.addf %104, %106 : vector<8x64xf32>
    %cst_34 = arith.constant 5.000000e-01 : f32
    %108 = vector.broadcast %cst_34 : f32 to vector<8x64xf32>
    %109 = arith.mulf %108, %107 : vector<8x64xf32>
    %cst_35 = arith.constant 0.707106769 : f32
    %110 = vector.broadcast %cst_35 : f32 to vector<8x64xf32>
    %111 = arith.mulf %107, %110 : vector<8x64xf32>
    %112 = math.erf %111 : vector<8x64xf32>
    %cst_36 = arith.constant 1.000000e+00 : f32
    %113 = vector.broadcast %cst_36 : f32 to vector<8x64xf32>
    %114 = arith.addf %113, %112 : vector<8x64xf32>
    %115 = arith.mulf %109, %114 : vector<8x64xf32>
    %116 = arith.truncf %115 : vector<8x64xf32> to vector<8x64xbf16>
    %117 = vector.extract_strided_slice %43 {offsets = [32, 0], sizes = [64, 32], strides = [1, 1]} : vector<96x64xbf16> to vector<64x32xbf16>
    %cst_37 = arith.constant dense<0.000000e+00> : vector<8x32xf32>
    %118 = tpu.matmul %116, %117, %cst_37 {dimension_numbers = #tpu.dot_dimension_numbers<[1], [0], [0], [1], [0, 0, 1, 1], [], []>} : vector<8x64xbf16>, vector<64x32xbf16>, vector<8x32xf32> -> vector<8x32xf32>
    %119 = vector.extract_strided_slice %0 {offsets = [8, 0], sizes = [1, 32], strides = [1, 1]} : vector<40x128xf32> to vector<1x32xf32>
    %120 = vector.broadcast %119 : vector<1x32xf32> to vector<8x32xf32>
    %121 = arith.addf %118, %120 : vector<8x32xf32>
    %122 = arith.addf %101, %121 : vector<8x32xf32>
    %123 = vector.extract_strided_slice %0 {offsets = [9, 0], sizes = [1, 32], strides = [1, 1]} : vector<40x128xf32> to vector<1x32xf32>
    %124 = vector.extract_strided_slice %0 {offsets = [10, 0], sizes = [1, 32], strides = [1, 1]} : vector<40x128xf32> to vector<1x32xf32>
    %cst_38 = arith.constant dense<0.000000e+00> : vector<8xf32>
    %125 = vector.multi_reduction <add>, %122, %cst_38 [1] : vector<8x32xf32> to vector<8xf32>
    %126 = vector.shape_cast %125 : vector<8xf32> to vector<8x1xf32>
    %cst_39 = arith.constant 3.200000e+01 : f32
    %127 = vector.broadcast %cst_39 : f32 to vector<8x1xf32>
    %128 = arith.divf %126, %127 : vector<8x1xf32>
    %129 = vector.broadcast %128 : vector<8x1xf32> to vector<8x32xf32>
    %130 = arith.subf %122, %129 : vector<8x32xf32>
    %131 = arith.mulf %130, %130 : vector<8x32xf32>
    %cst_40 = arith.constant dense<0.000000e+00> : vector<8xf32>
    %132 = vector.multi_reduction <add>, %131, %cst_40 [1] : vector<8x32xf32> to vector<8xf32>
    %133 = vector.shape_cast %132 : vector<8xf32> to vector<8x1xf32>
    %cst_41 = arith.constant 3.200000e+01 : f32
    %134 = vector.broadcast %cst_41 : f32 to vector<8x1xf32>
    %135 = arith.divf %133, %134 : vector<8x1xf32>
    %136 = vector.broadcast %128 : vector<8x1xf32> to vector<8x32xf32>
    %137 = arith.subf %122, %136 : vector<8x32xf32>
    %cst_42 = arith.constant 9.99999996E-13 : f32
    %138 = vector.broadcast %cst_42 : f32 to vector<8x1xf32>
    %139 = arith.addf %135, %138 : vector<8x1xf32>
    %140 = math.rsqrt %139 : vector<8x1xf32>
    %141 = vector.broadcast %140 : vector<8x1xf32> to vector<8x32xf32>
    %142 = arith.mulf %137, %141 : vector<8x32xf32>
    %143 = vector.broadcast %123 : vector<1x32xf32> to vector<8x32xf32>
    %144 = arith.mulf %142, %143 : vector<8x32xf32>
    %145 = vector.broadcast %124 : vector<1x32xf32> to vector<8x32xf32>
    %146 = arith.addf %144, %145 : vector<8x32xf32>
    %c1 = arith.constant 1 : index
    %c0_43 = arith.constant 0 : index
    %c0_44 = arith.constant 0 : index
    %c0_45 = arith.constant 0 : index
    %147 = vector.load %arg4[%c1, %c0_43, %c0_44, %c0_45] : memref<2x4x32x24xbf16, #tpu.memory_space<vmem>>, vector<1x4x32x24xbf16>
    %148 = vector.shape_cast %147 : vector<1x4x32x24xbf16> to vector<4x32x24xbf16>
    %c1_46 = arith.constant 1 : index
    %c0_47 = arith.constant 0 : index
    %c0_48 = arith.constant 0 : index
    %c0_49 = arith.constant 0 : index
    %149 = vector.load %arg5[%c1_46, %c0_47, %c0_48, %c0_49] : memref<2x4x8x32xbf16, #tpu.memory_space<vmem>>, vector<1x4x8x32xbf16>
    %150 = vector.shape_cast %149 : vector<1x4x8x32xbf16> to vector<4x8x32xbf16>
    %c1_50 = arith.constant 1 : index
    %c0_51 = arith.constant 0 : index
    %c0_52 = arith.constant 0 : index
    %151 = vector.load %arg6[%c1_50, %c0_51, %c0_52] : memref<2x96x64xbf16, #tpu.memory_space<vmem>>, vector<1x96x64xbf16>
    %152 = vector.shape_cast %151 : vector<1x96x64xbf16> to vector<96x64xbf16>
    %153 = vector.extract_strided_slice %0 {offsets = [16, 0], sizes = [4, 24], strides = [1, 1]} : vector<40x128xf32> to vector<4x24xf32>
    %154 = arith.truncf %146 : vector<8x32xf32> to vector<8x32xbf16>
    %155 = vector.shape_cast %154 : vector<8x32xbf16> to vector<1x8x32xbf16>
    %156 = vector.broadcast %155 : vector<1x8x32xbf16> to vector<4x8x32xbf16>
    "tpu.trace_start"() <{level = 10 : i32, message = "hsk,hkd->hsd"}> : () -> ()
    %cst_53 = arith.constant dense<0.000000e+00> : vector<4x8x24xf32>
    %157 = tpu.matmul %156, %148, %cst_53 {dimension_numbers = #tpu.dot_dimension_numbers<[2], [1], [1], [2], [0, 0, 0, 1, 1, 2], [0], [0]>} : vector<4x8x32xbf16>, vector<4x32x24xbf16>, vector<4x8x24xf32> -> vector<4x8x24xf32>
    "tpu.trace_stop"() : () -> ()
    %158 = vector.shape_cast %153 : vector<4x24xf32> to vector<4x1x24xf32>
    %159 = vector.broadcast %158 : vector<4x1x24xf32> to vector<4x8x24xf32>
    %160 = arith.addf %157, %159 : vector<4x8x24xf32>
    %161 = vector.extract_strided_slice %160 {offsets = [0, 0, 0], sizes = [4, 8, 8], strides = [1, 1, 1]} : vector<4x8x24xf32> to vector<4x8x8xf32>
    %162 = arith.truncf %161 : vector<4x8x8xf32> to vector<4x8x8xbf16>
    %163 = vector.extract_strided_slice %160 {offsets = [0, 0, 8], sizes = [4, 8, 8], strides = [1, 1, 1]} : vector<4x8x24xf32> to vector<4x8x8xf32>
    %164 = arith.truncf %163 : vector<4x8x8xf32> to vector<4x8x8xbf16>
    %165 = vector.extract_strided_slice %160 {offsets = [0, 0, 16], sizes = [4, 8, 8], strides = [1, 1, 1]} : vector<4x8x24xf32> to vector<4x8x8xf32>
    %166 = arith.truncf %165 : vector<4x8x8xf32> to vector<4x8x8xbf16>
    "tpu.trace_start"() <{level = 10 : i32, message = "hqd,hkd->hqk"}> : () -> ()
    %cst_54 = arith.constant dense<0.000000e+00> : vector<4x8x8xf32>
    %167 = tpu.matmul %162, %164, %cst_54 {dimension_numbers = #tpu.dot_dimension_numbers<[2], [2], [1], [1], [0, 0, 0, 1, 1, 1], [0], [0]>} : vector<4x8x8xbf16>, vector<4x8x8xbf16>, vector<4x8x8xf32> -> vector<4x8x8xf32>
    "tpu.trace_stop"() : () -> ()
    %cst_55 = arith.constant dense<0xFF800000> : vector<4x8xf32>
    %168 = vector.multi_reduction <maximumf>, %167, %cst_55 [2] : vector<4x8x8xf32> to vector<4x8xf32>
    %169 = vector.shape_cast %168 : vector<4x8xf32> to vector<4x8x1xf32>
    %170 = vector.broadcast %169 : vector<4x8x1xf32> to vector<4x8x8xf32>
    %171 = arith.subf %167, %170 : vector<4x8x8xf32>
    %172 = math.exp %171 : vector<4x8x8xf32>
    %cst_56 = arith.constant dense<0.000000e+00> : vector<4x8xf32>
    %173 = vector.multi_reduction <add>, %172, %cst_56 [2] : vector<4x8x8xf32> to vector<4x8xf32>
    %174 = vector.shape_cast %173 : vector<4x8xf32> to vector<4x8x1xf32>
    %175 = tpu.reciprocal %174 {approx = true} : vector<4x8x1xf32> -> vector<4x8x1xf32>
    %176 = vector.broadcast %175 : vector<4x8x1xf32> to vector<4x8x8xf32>
    %177 = arith.mulf %172, %176 : vector<4x8x8xf32>
    %178 = arith.truncf %177 : vector<4x8x8xf32> to vector<4x8x8xbf16>
    "tpu.trace_start"() <{level = 10 : i32, message = "hqk,hkd->hqd"}> : () -> ()
    %cst_57 = arith.constant dense<0.000000e+00> : vector<4x8x8xf32>
    %179 = tpu.matmul %178, %166, %cst_57 {dimension_numbers = #tpu.dot_dimension_numbers<[2], [1], [1], [2], [0, 0, 0, 1, 1, 2], [0], [0]>} : vector<4x8x8xbf16>, vector<4x8x8xbf16>, vector<4x8x8xf32> -> vector<4x8x8xf32>
    "tpu.trace_stop"() : () -> ()
    %180 = arith.truncf %179 : vector<4x8x8xf32> to vector<4x8x8xbf16>
    "tpu.trace_start"() <{level = 10 : i32, message = "hsd,hdk->hsk"}> : () -> ()
    %cst_58 = arith.constant dense<0.000000e+00> : vector<4x8x32xf32>
    %181 = tpu.matmul %180, %150, %cst_58 {dimension_numbers = #tpu.dot_dimension_numbers<[2], [1], [1], [2], [0, 0, 0, 1, 1, 2], [0], [0]>} : vector<4x8x8xbf16>, vector<4x8x32xbf16>, vector<4x8x32xf32> -> vector<4x8x32xf32>
    "tpu.trace_stop"() : () -> ()
    %cst_59 = arith.constant dense<0.000000e+00> : vector<8x32xf32>
    %182 = vector.multi_reduction <add>, %181, %cst_59 [0] : vector<4x8x32xf32> to vector<8x32xf32>
    %183 = vector.extract_strided_slice %0 {offsets = [20, 0], sizes = [1, 32], strides = [1, 1]} : vector<40x128xf32> to vector<1x32xf32>
    %184 = vector.broadcast %183 : vector<1x32xf32> to vector<8x32xf32>
    %185 = arith.addf %182, %184 : vector<8x32xf32>
    %186 = arith.addf %146, %185 : vector<8x32xf32>
    %187 = vector.extract_strided_slice %0 {offsets = [21, 0], sizes = [1, 32], strides = [1, 1]} : vector<40x128xf32> to vector<1x32xf32>
    %188 = vector.extract_strided_slice %0 {offsets = [22, 0], sizes = [1, 32], strides = [1, 1]} : vector<40x128xf32> to vector<1x32xf32>
    %cst_60 = arith.constant dense<0.000000e+00> : vector<8xf32>
    %189 = vector.multi_reduction <add>, %186, %cst_60 [1] : vector<8x32xf32> to vector<8xf32>
    %190 = vector.shape_cast %189 : vector<8xf32> to vector<8x1xf32>
    %cst_61 = arith.constant 3.200000e+01 : f32
    %191 = vector.broadcast %cst_61 : f32 to vector<8x1xf32>
    %192 = arith.divf %190, %191 : vector<8x1xf32>
    %193 = vector.broadcast %192 : vector<8x1xf32> to vector<8x32xf32>
    %194 = arith.subf %186, %193 : vector<8x32xf32>
    %195 = arith.mulf %194, %194 : vector<8x32xf32>
    %cst_62 = arith.constant dense<0.000000e+00> : vector<8xf32>
    %196 = vector.multi_reduction <add>, %195, %cst_62 [1] : vector<8x32xf32> to vector<8xf32>
    %197 = vector.shape_cast %196 : vector<8xf32> to vector<8x1xf32>
    %cst_63 = arith.constant 3.200000e+01 : f32
    %198 = vector.broadcast %cst_63 : f32 to vector<8x1xf32>
    %199 = arith.divf %197, %198 : vector<8x1xf32>
    %200 = vector.broadcast %192 : vector<8x1xf32> to vector<8x32xf32>
    %201 = arith.subf %186, %200 : vector<8x32xf32>
    %cst_64 = arith.constant 9.99999996E-13 : f32
    %202 = vector.broadcast %cst_64 : f32 to vector<8x1xf32>
    %203 = arith.addf %199, %202 : vector<8x1xf32>
    %204 = math.rsqrt %203 : vector<8x1xf32>
    %205 = vector.broadcast %204 : vector<8x1xf32> to vector<8x32xf32>
    %206 = arith.mulf %201, %205 : vector<8x32xf32>
    %207 = vector.broadcast %187 : vector<1x32xf32> to vector<8x32xf32>
    %208 = arith.mulf %206, %207 : vector<8x32xf32>
    %209 = vector.broadcast %188 : vector<1x32xf32> to vector<8x32xf32>
    %210 = arith.addf %208, %209 : vector<8x32xf32>
    %211 = arith.truncf %210 : vector<8x32xf32> to vector<8x32xbf16>
    %212 = vector.extract_strided_slice %152 {offsets = [0, 0], sizes = [32, 64], strides = [1, 1]} : vector<96x64xbf16> to vector<32x64xbf16>
    %cst_65 = arith.constant dense<0.000000e+00> : vector<8x64xf32>
    %213 = tpu.matmul %211, %212, %cst_65 {dimension_numbers = #tpu.dot_dimension_numbers<[1], [0], [0], [1], [0, 0, 1, 1], [], []>} : vector<8x32xbf16>, vector<32x64xbf16>, vector<8x64xf32> -> vector<8x64xf32>
    %214 = vector.extract_strided_slice %0 {offsets = [23, 0], sizes = [1, 64], strides = [1, 1]} : vector<40x128xf32> to vector<1x64xf32>
    %215 = vector.broadcast %214 : vector<1x64xf32> to vector<8x64xf32>
    %216 = arith.addf %213, %215 : vector<8x64xf32>
    %cst_66 = arith.constant 5.000000e-01 : f32
    %217 = vector.broadcast %cst_66 : f32 to vector<8x64xf32>
    %218 = arith.mulf %217, %216 : vector<8x64xf32>
    %cst_67 = arith.constant 0.707106769 : f32
    %219 = vector.broadcast %cst_67 : f32 to vector<8x64xf32>
    %220 = arith.mulf %216, %219 : vector<8x64xf32>
    %221 = math.erf %220 : vector<8x64xf32>
    %cst_68 = arith.constant 1.000000e+00 : f32
    %222 = vector.broadcast %cst_68 : f32 to vector<8x64xf32>
    %223 = arith.addf %222, %221 : vector<8x64xf32>
    %224 = arith.mulf %218, %223 : vector<8x64xf32>
    %225 = arith.truncf %224 : vector<8x64xf32> to vector<8x64xbf16>
    %226 = vector.extract_strided_slice %152 {offsets = [32, 0], sizes = [64, 32], strides = [1, 1]} : vector<96x64xbf16> to vector<64x32xbf16>
    %cst_69 = arith.constant dense<0.000000e+00> : vector<8x32xf32>
    %227 = tpu.matmul %225, %226, %cst_69 {dimension_numbers = #tpu.dot_dimension_numbers<[1], [0], [0], [1], [0, 0, 1, 1], [], []>} : vector<8x64xbf16>, vector<64x32xbf16>, vector<8x32xf32> -> vector<8x32xf32>
    %228 = vector.extract_strided_slice %0 {offsets = [24, 0], sizes = [1, 32], strides = [1, 1]} : vector<40x128xf32> to vector<1x32xf32>
    %229 = vector.broadcast %228 : vector<1x32xf32> to vector<8x32xf32>
    %230 = arith.addf %227, %229 : vector<8x32xf32>
    %231 = arith.addf %210, %230 : vector<8x32xf32>
    %232 = vector.extract_strided_slice %0 {offsets = [25, 0], sizes = [1, 32], strides = [1, 1]} : vector<40x128xf32> to vector<1x32xf32>
    %233 = vector.extract_strided_slice %0 {offsets = [26, 0], sizes = [1, 32], strides = [1, 1]} : vector<40x128xf32> to vector<1x32xf32>
    %cst_70 = arith.constant dense<0.000000e+00> : vector<8xf32>
    %234 = vector.multi_reduction <add>, %231, %cst_70 [1] : vector<8x32xf32> to vector<8xf32>
    %235 = vector.shape_cast %234 : vector<8xf32> to vector<8x1xf32>
    %cst_71 = arith.constant 3.200000e+01 : f32
    %236 = vector.broadcast %cst_71 : f32 to vector<8x1xf32>
    %237 = arith.divf %235, %236 : vector<8x1xf32>
    %238 = vector.broadcast %237 : vector<8x1xf32> to vector<8x32xf32>
    %239 = arith.subf %231, %238 : vector<8x32xf32>
    %240 = arith.mulf %239, %239 : vector<8x32xf32>
    %cst_72 = arith.constant dense<0.000000e+00> : vector<8xf32>
    %241 = vector.multi_reduction <add>, %240, %cst_72 [1] : vector<8x32xf32> to vector<8xf32>
    %242 = vector.shape_cast %241 : vector<8xf32> to vector<8x1xf32>
    %cst_73 = arith.constant 3.200000e+01 : f32
    %243 = vector.broadcast %cst_73 : f32 to vector<8x1xf32>
    %244 = arith.divf %242, %243 : vector<8x1xf32>
    %245 = vector.broadcast %237 : vector<8x1xf32> to vector<8x32xf32>
    %246 = arith.subf %231, %245 : vector<8x32xf32>
    %cst_74 = arith.constant 9.99999996E-13 : f32
    %247 = vector.broadcast %cst_74 : f32 to vector<8x1xf32>
    %248 = arith.addf %244, %247 : vector<8x1xf32>
    %249 = math.rsqrt %248 : vector<8x1xf32>
    %250 = vector.broadcast %249 : vector<8x1xf32> to vector<8x32xf32>
    %251 = arith.mulf %246, %250 : vector<8x32xf32>
    %252 = vector.broadcast %232 : vector<1x32xf32> to vector<8x32xf32>
    %253 = arith.mulf %251, %252 : vector<8x32xf32>
    %254 = vector.broadcast %233 : vector<1x32xf32> to vector<8x32xf32>
    %255 = arith.addf %253, %254 : vector<8x32xf32>
    %256 = vector.extract_strided_slice %0 {offsets = [32, 0], sizes = [1, 32], strides = [1, 1]} : vector<40x128xf32> to vector<1x32xf32>
    %257 = vector.extract_strided_slice %0 {offsets = [33, 0], sizes = [1, 32], strides = [1, 1]} : vector<40x128xf32> to vector<1x32xf32>
    %cst_75 = arith.constant dense<0.000000e+00> : vector<8xf32>
    %258 = vector.multi_reduction <add>, %255, %cst_75 [1] : vector<8x32xf32> to vector<8xf32>
    %259 = vector.shape_cast %258 : vector<8xf32> to vector<8x1xf32>
    %cst_76 = arith.constant 3.200000e+01 : f32
    %260 = vector.broadcast %cst_76 : f32 to vector<8x1xf32>
    %261 = arith.divf %259, %260 : vector<8x1xf32>
    %262 = vector.broadcast %261 : vector<8x1xf32> to vector<8x32xf32>
    %263 = arith.subf %255, %262 : vector<8x32xf32>
    %264 = arith.mulf %263, %263 : vector<8x32xf32>
    %cst_77 = arith.constant dense<0.000000e+00> : vector<8xf32>
    %265 = vector.multi_reduction <add>, %264, %cst_77 [1] : vector<8x32xf32> to vector<8xf32>
    %266 = vector.shape_cast %265 : vector<8xf32> to vector<8x1xf32>
    %cst_78 = arith.constant 3.200000e+01 : f32
    %267 = vector.broadcast %cst_78 : f32 to vector<8x1xf32>
    %268 = arith.divf %266, %267 : vector<8x1xf32>
    %269 = vector.broadcast %261 : vector<8x1xf32> to vector<8x32xf32>
    %270 = arith.subf %255, %269 : vector<8x32xf32>
    %cst_79 = arith.constant 9.99999996E-13 : f32
    %271 = vector.broadcast %cst_79 : f32 to vector<8x1xf32>
    %272 = arith.addf %268, %271 : vector<8x1xf32>
    %273 = math.rsqrt %272 : vector<8x1xf32>
    %274 = vector.broadcast %273 : vector<8x1xf32> to vector<8x32xf32>
    %275 = arith.mulf %270, %274 : vector<8x32xf32>
    %276 = vector.broadcast %256 : vector<1x32xf32> to vector<8x32xf32>
    %277 = arith.mulf %275, %276 : vector<8x32xf32>
    %278 = vector.broadcast %257 : vector<1x32xf32> to vector<8x32xf32>
    %279 = arith.addf %277, %278 : vector<8x32xf32>
    %cst_80 = arith.constant 5.000000e-01 : f32
    %280 = vector.broadcast %cst_80 : f32 to vector<8x32xf32>
    %281 = arith.mulf %280, %279 : vector<8x32xf32>
    %cst_81 = arith.constant 0.707106769 : f32
    %282 = vector.broadcast %cst_81 : f32 to vector<8x32xf32>
    %283 = arith.mulf %279, %282 : vector<8x32xf32>
    %284 = math.erf %283 : vector<8x32xf32>
    %cst_82 = arith.constant 1.000000e+00 : f32
    %285 = vector.broadcast %cst_82 : f32 to vector<8x32xf32>
    %286 = arith.addf %285, %284 : vector<8x32xf32>
    %287 = arith.mulf %281, %286 : vector<8x32xf32>
    %288 = arith.truncf %287 : vector<8x32xf32> to vector<8x32xbf16>
    %c0_83 = arith.constant 0 : index
    %c0_84 = arith.constant 0 : index
    %289 = vector.load %arg7[%c0_83, %c0_84] : memref<32x128xbf16, #tpu.memory_space<vmem>>, vector<32x128xbf16>
    %cst_85 = arith.constant dense<0.000000e+00> : vector<8x128xf32>
    %290 = tpu.matmul %288, %289, %cst_85 {dimension_numbers = #tpu.dot_dimension_numbers<[1], [0], [0], [1], [0, 0, 1, 1], [], []>} : vector<8x32xbf16>, vector<32x128xbf16>, vector<8x128xf32> -> vector<8x128xf32>
    %291 = vector.extract_strided_slice %0 {offsets = [34, 0], sizes = [1, 128], strides = [1, 1]} : vector<40x128xf32> to vector<1x128xf32>
    %292 = vector.broadcast %291 : vector<1x128xf32> to vector<8x128xf32>
    %293 = arith.addf %290, %292 : vector<8x128xf32>
    %c0_86 = arith.constant 0 : index
    %c0_87 = arith.constant 0 : index
    %294 = vector.load %arg8[%c0_86, %c0_87] : memref<8x128xf32, #tpu.memory_space<vmem>>, vector<8x128xf32>
    tpu.vector_store %arg8[%c0_86, %c0_87], %293 {strides = array<i32>} : memref<8x128xf32, #tpu.memory_space<vmem>>, vector<8x128xf32>,
    return
  }
  func.func @transform_0(%arg0: i32) -> (i32, i32) {
    %c0_i32 = arith.constant 0 : i32
    %c0_i32_0 = arith.constant 0 : i32
    return %arg0, %c0_i32 : i32, i32
  }
  func.func @transform_1(%arg0: i32) -> (i32, i32) {
    %c0_i32 = arith.constant 0 : i32
    %c0_i32_0 = arith.constant 0 : i32
    %c0_i32_1 = arith.constant 0 : i32
    return %c0_i32, %c0_i32_0 : i32, i32
  }
  func.func @transform_2(%arg0: i32) -> (i32, i32) {
    %c0_i32 = arith.constant 0 : i32
    %c0_i32_0 = arith.constant 0 : i32
    %c0_i32_1 = arith.constant 0 : i32
    return %c0_i32, %c0_i32_0 : i32, i32
  }
  func.func @transform_3(%arg0: i32) -> (i32, i32, i32, i32) {
    %c0_i32 = arith.constant 0 : i32
    %c0_i32_0 = arith.constant 0 : i32
    %c0_i32_1 = arith.constant 0 : i32
    %c0_i32_2 = arith.constant 0 : i32
    %c0_i32_3 = arith.constant 0 : i32
    return %c0_i32, %c0_i32_0, %c0_i32_1, %c0_i32_2 : i32, i32, i32, i32
  }
  func.func @transform_4(%arg0: i32) -> (i32, i32, i32, i32) {
    %c0_i32 = arith.constant 0 : i32
    %c0_i32_0 = arith.constant 0 : i32
    %c0_i32_1 = arith.constant 0 : i32
    %c0_i32_2 = arith.constant 0 : i32
    %c0_i32_3 = arith.constant 0 : i32
    return %c0_i32, %c0_i32_0, %c0_i32_1, %c0_i32_2 : i32, i32, i32, i32
  }
  func.func @transform_5(%arg0: i32) -> (i32, i32, i32) {
    %c0_i32 = arith.constant 0 : i32
    %c0_i32_0 = arith.constant 0 : i32
    %c0_i32_1 = arith.constant 0 : i32
    %c0_i32_2 = arith.constant 0 : i32
    return %c0_i32, %c0_i32_0, %c0_i32_1 : i32, i32, i32
  }
  func.func @transform_6(%arg0: i32) -> (i32, i32) {
    %c0_i32 = arith.constant 0 : i32
    %c0_i32_0 = arith.constant 0 : i32
    %c0_i32_1 = arith.constant 0 : i32
    return %c0_i32, %c0_i32_0 : i32, i32
  }
  func.func @transform_7(%arg0: i32) -> (i32, i32) {
    %c0_i32 = arith.constant 0 : i32
    %c0_i32_0 = arith.constant 0 : i32
    return %arg0, %c0_i32 : i32, i32
  }
}

</mosaic_0001>

<bundles_post_ra>
// kernel: distilbert_mlm_forward.1
= control target key start
LH: loop header
LB: loop body
LE: loop exit
PB: predicated region body
PF: predicated region fallthrough
CT: control target
= control target key end

     0   :  { %12 = vsyncpa [#allocation3], 0  ;;  %s4183_s0 = inlined_call_operand.vmem [shape: s32[16,1], index: 0, kind: input, shape index: {}]   ;;  %s4184_s1 = inlined_call_operand.vmem [shape: f32[40,128], index: 1, kind: input, shape index: {}]   ;;  %s4185_s2 = inlined_call_operand.vmem [shape: bf16[144,32], index: 2, kind: input, shape index: {}]   ;;  %s4186_s3 = inlined_call_operand.vmem [shape: bf16[2,4,32,24], index: 3, kind: input, shape index: {}]   ;;  %s4187_s4 = inlined_call_operand.vmem [shape: bf16[2,4,8,32], index: 4, kind: input, shape index: {}]   ;;  %s4188_s5 = inlined_call_operand.vmem [shape: bf16[2,96,64], index: 5, kind: input, shape index: {}]   ;;  %s4189_s6 = inlined_call_operand.vmem [shape: bf16[32,128], index: 6, kind: input, shape index: {}]   ;;  %s4190_s7 = inlined_call_operand.hbm [shape: f32[16,128], index: 7, kind: output, shape index: {}]  }
   0x1   :  { %14 = vsyncpa [#allocation3 + $0x1], 0  ;;  %s3555_s24 = smov 0   ;;  %s3557_s25 = smov 0  }
   0x2   :  { %s3559_s26 = smov 0   ;;  %s3561_s27 = smov 0  }
   0x3 LB: > { %s3576_s28 = sadd.s32 4294967295, %s3505_s27   ;;  %s2813_s29 = sadd.s32 4294967294, %s3505_s27   ;;  %s3505_s27 = sphi %s3561_s27, %s4196_s27   ;;  %s3501_s26 = sphi %s3559_s26, %s4195_s26   ;;  %s3497_s25 = sphi %s3557_s25, %s4194_s25   ;;  %s3493_s24 = sphi %s3555_s24, %s4193_s24  }
   0x4   : > { %s3580_s30 = sadd.s32 1, %s3505_s27   ;;  %s179_s8 = sadd.s32 1, %s3501_s26 }
   0x5   : > { %s176_s9 = ssub.s32 %s3505_s27, %s3580_s30  ;;  %p189_p0 = scmp.ne.s32.totalorder %s3501_s26, %s3497_s25 }
   0x6   : > { %p177_p1 = scmp.eq.s32.totalorder %s176_s9, 0  ;;  %p190_p2 = scmp.eq.s32.totalorder %s3576_s28, 1 }
   0x7   : > { %p195_p3 = scmp.ne.s32.totalorder %s3497_s25, %s3493_s24  ;;  %p196_p4 = scmp.eq.s32.totalorder %s2813_s29, 1 }
   0x8   : > { %s3591_s10 = scalar_select %p177_p1, %s3501_s26, %s179_s8  }
   0x9   : > { %p3593_p5 = por %p190_p2, %p189_p0  ;;  %p3597_p6 = por %p196_p4, %p195_p3 }
   0xa   : > { %p2816_p7 = scmp.ge.s32.totalorder %s3505_s27, 1  ;;  %p239_p8 = scmp.lt.s32.totalorder %s3505_s27, 3 }
   0xc   : > { %p240_p9 = pnand %p2816_p7, %p239_p8 }
   0xd   : > { %p270_p10 = scmp.lt.s32.totalorder (!%p240_p9), %s3576_s28, 1  ;;  %s3512_s14 = smov (!%p240_p9), 120  }
   0xe   : > { %243 = sbr.rel (%p240_p9) target bundleno = 5745 (0x1671), region = 48  ;;  %s2930_s20 = sshll.u32 (!%p240_p9), %s3576_s28, 7 }
   0xf   : > { %s4142_s8 = scalar_lea.hbm (!%p240_p9), %s4190_s7, %s2930_s20 }
  0x13   : > { %v3356_v0 = vld [vmem:[%s4185_s2 + $0x38] sm:$0xff]   ;;  %v3507_v1 = vmov 0   ;;  %v3508_v2 = vmov 0.0   ;;  %s271_s15 = scalar_select %p270_p10, %s3576_s28, 1  ;;  %v3357_v3 = vld [vmem:[%s4185_s2 + $0x30] sm:$0xff]   ;;  %v3358_v5 = vld [vmem:[%s4185_s2 + $0x28] sm:$0xff]   ;;  %v297_v11 = vlaneseq }
  0x14   : > { %3355 = vset.pattern.permute.xlu0 %v3507_v1  ;;  %3033 = vmatprep.subr.bf16.mxu0 %v3508_v2  ;;  %vm3509_vm0 = vmmov 0   ;;  %v3359_v6 = vld [vmem:[%s4185_s2 + $0x20] sm:$0xff]   ;;  %v3360_v7 = vld [vmem:[%s4185_s2 + $0x18] sm:$0xff]   ;;  %v3361_v8 = vld [vmem:[%s4185_s2 + $0x10] sm:$0xff]   ;;  %v3510_v14 = vmov 1.0|1.0  }
  0x15   : > { %3034 = vmatpush3.bf16.msra.mxu0 %v3356_v0  ;;  %3053 = vmatprep.subr.bf16.mxu1 %v3508_v2  ;;  %s2818_s18 = sshll.u32 %s271_s15, 3  ;;  %v3362_v9 = vld [vmem:[%s4185_s2 + $0x8] sm:$0xff]   ;;  %v3363_v10 = vld [vmem:[%s4185_s2] sm:$0xff]   ;;  %v298_v12 = vand.u32 127, %v297_v11  ;;  %vm396_vm3 = vcmask 261120   ;;  %v3661_v33 = vshrl.u32 %v297_v11, 7 }
  0x16   : > { %3035 = vmatprep.subr.bf16.mxu0 %v3508_v2  ;;  %s273_s21 = scalar_lea.vmem %s4183_s0, %s2818_s18  ;;  %3049 = vmatprep.mubr.msk.bf16.mxu0 %vm3509_vm0, %v3508_v2  ;;  %v296_v15 = vld [vmem:[%s4185_s2 + $0x40] sm:$0xf]  ;;  %v3364_v28 = vld [vmem:[%s4186_s3 + $0x8] sm:$0xff]   ;;  %v3366_v43 = vld [vmem:[%s4186_s3 + $0x18] sm:$0xff]   ;;  %v3511_v50 = vmov 1966171168  }
  0x17   : > { %v299_v4 = vld [vmem:[%s273_s21] sm:$0xff]  ;;  %3057 = vmatprep.mubr.msk.bf16.mxu1 %vm3509_vm0, %v3508_v2  ;;  %v307_v16 = vunpack.c.l.bf16 %v296_v15  ;;  %3054 = vmatpush3.bf16.msra.mxu1 %v3364_v28  ;;  %v3664_v34 = vsub.s32 0, %v3661_v33  ;;  %v3670_v36 = vsub.s32 1, %v3661_v33  ;;  %v3367_v45 = vld [vmem:[%s4186_s3 + $0x10] sm:$0xff]   ;;  %v3368_v46 = vld [vmem:[%s4186_s3 + $0x28] sm:$0xff]   ;;  %v456_v51 = vunpack.c.l.s4 %v3511_v50  ;;  %s3513_s15 = smov 112  }
  0x18   : > { %301 = vperm.xlu0 %3355, %v299_v4   ;;  %v3365_v29 = vld [vmem:[%s4186_s3] sm:$0xff]   ;;  %3055 = vmatprep.subr.bf16.mxu1 %v3508_v2  ;;  %v3370_v48 = vld [vmem:[%s4186_s3 + $0x38] sm:$0xff]   ;;  %v3371_v49 = vld [vmem:[%s4186_s3 + $0x30] sm:$0xff]   ;;  %vm717_vm4 = vcmask 64512   ;;  %vm964_vm5 = vcmask 1043456   ;;  %vm1470_vm6 = vcmask 523264  }
  0x19   : > { %3036 = vmatpush3.bf16.msra.mxu0 %v3357_v3  ;;  %v279_v35 = vld [vmem:[%s4184_s1 + $0x20] sm:$0xff]  ;;  %v457_v52 = vunpack.c.0.s8 %v456_v51  ;;  %s267_s18 = sand.u32 1, %s3497_s25   ;;  %s3514_s28 = smov [#allocation2]  }
  0x1a   : > { %3037 = vmatprep.subr.bf16.mxu0 %v3508_v2  ;;  %v3673_v37 = vrot.slane %v279_v35, %v3664_v34  ;;  %v3676_v40 = vrot.slane %v279_v35, %v3670_v36  ;;  %v3369_v47 = vld [vmem:[%s4186_s3 + $0x20] sm:$0xff]   ;;  %s2817_s19 = sshll.u32 %s267_s18, 3  ;;  %s2741_s9 = scalar_lea.sflag [#allocation3], %s267_s18 }
  0x1b   : > { %3056 = vmatpush3.bf16.msra.mxu1 %v3365_v29  ;;  %v3721_v53 = vsub.s32 %v457_v52, %v3661_v33  ;;  %v3726_v54 = vld [vmem:[%s4184_s1] sm:$0xff]  ;;  %s269_s21 = scalar_lea.vmem [#allocation2], %s2817_s19  ;;  %s3449_s16 = sshll.u32 %s3514_s28, 4  ;;  %s3450_s16 = int_to_ptr.vmem [resolvable:$false] %s3449_s16 }
  0x1c   : > { %3061 = vmatprep.subr.bf16.mxu1 %v3508_v2  ;;  %s2754_s22 = sshll.u32 %s269_s21, 4  ;;  %s3451_s17 = scalar_lea.vmem %s3450_s16, 256  ;;  %s4144_s22 = int_to_ptr.vmem [resolvable:$true] %s2754_s22 }
  0x1d   : > { %3038 = vmatpush3.bf16.msra.mxu0 %v3358_v5  ;;  %v461_v55 = vrot.slane %v3726_v54, %v3721_v53  ;;  %s3445_s13 = scalar_lea.vmem %s4144_s22, 128  ;;  %p3452_p0 = scmp.lt.s32.totalorder %s4144_s22, %s3450_s16 }
  0x1e   : > { %3039 = vmatprep.subr.bf16.mxu0 %v3508_v2  ;;  %p3446_p11 = scmp.ne.s32.totalorder %s4144_s22, %s3445_s13  ;;  %p3453_p1 = scmp.lt.s32.totalorder %s3451_s17, %s3445_s13 }
  0x1f   : > { %v469_v56 = vrot.slane %v461_v55, %v3721_v53  ;;  %v462_v58 = vcombine.high %v461_v55, %v461_v55 }
  0x20   : > { %p3447_p12 = pnand %p3446_p11, %p3593_p5  ;;  %p3454_p2 = por %p3453_p1, %p3452_p0 }
  0x21   : > { %3040 = vmatpush3.bf16.msra.mxu0 %v3359_v6  ;;  %v482_v57 = vrot.slane %v469_v56, %v3664_v34  ;;  %v476_v61 = vrot.slane %v462_v58, %v3721_v53  ;;  %v477_v6 = vcombine.high %v469_v56, %v469_v56 }
  0x22   : > { %3041 = vmatprep.subr.bf16.mxu0 %v3508_v2  ;;  %p3448_p13 = pneg %p3447_p12 }
  0x23   : > { %v486_v1 = vrot.slane %v476_v61, %v3664_v34 }
  0x24   : > { %p3455_p3 = pnand %p3454_p2, %p3448_p13 }
  0x25   : > { %3042 = vmatpush3.bf16.msra.mxu0 %v3360_v7 }
  0x26   : > { %3043 = vmatprep.subr.bf16.mxu0 %v3508_v2 }
  0x29   : > { %3044 = vmatpush3.bf16.msra.mxu0 %v3361_v8 }
  0x2a   : > { %3045 = vmatprep.subr.bf16.mxu0 %v3508_v2 }
  0x2d   : > { %3046 = vmatpush3.bf16.msra.mxu0 %v3362_v9 }
  0x2e   : > { %3047 = vmatprep.subr.bf16.mxu0 %v3508_v2 }
  0x31   : > { %3048 = vmatpush3.bf16.msra.mxu0 %v3363_v10  ;;  %v490_v10 = vrot.slane %v477_v6, %v3664_v34 }
  0x32   : > { %3085 = vmatprep.subr.bf16.mxu0 %v3508_v2 }
  0x93   : > { %v302_v13 = vpop.permute.xlu0 %301 }
  0x94   : > { %vm303_vm1 = vcmp.eq.s32.totalorder %v302_v13, %v298_v12 }
  0x95   : > { %vm2828_vm2 = vmpackc.low %vm303_vm1, %vm303_vm1 }
  0x96   : > { %3050 = vmatmul.mubr.msk.bf16.vlgmr.msra.gmra.mxu0 %vm2828_vm2, %v3510_v14  ;;  %v478_v14 = vcombine.high %v476_v61, %v476_v61 }
  0x97   : > { %3087 = vmatprep.mubr.msk.bf16.mxu0 %vm3509_vm0, %v3508_v2 }
 0x156   : > { %v390_v17 = vpop.f32.mrf.mxu0 }
 0x157   : > { %v391_v18 = vadd.f32 %v390_v17, %v307_v16 }
 0x158   : > { %v3051_v19 = vpop.f32.mrf.mxu0 }
 0x159   : > { %v397_v20 = vsel %vm396_vm3, %v391_v18, 0.0 }
 0x15a   : > { %398 = vadd.xlane.f32.xlu0 %v397_v20  ;;  %v393_v21 = vpop.f32.mrf.mxu0 }
 0x15c   : > { %v3052_v22 = vpop.f32.mrf.mxu0 }
 0x1e3   : > { %v399_v23 = vpop.xlane.xlu0 %398 }
 0x1e4   : > { %v401_v24 = vmul.f32 0.03125, %v399_v23 }
 0x1e6   : > { %v402_v25 = vsub.f32 %v391_v18, %v401_v24  ;;  %v494_v18 = vrot.slane %v478_v14, %v3664_v34 }
 0x1e8   : > { %v403_v26 = vmul.f32 %v402_v25, %v402_v25 }
 0x1ea   : > { %v404_v27 = vsel %vm396_vm3, %v403_v26, 0.0 }
 0x1eb   : > { %405 = vadd.xlane.f32.xlu1 %v404_v27 }
 0x274   : > { %v406_v30 = vpop.xlane.xlu1 %405 }
 0x275   : > { %v407_v31 = vmul.f32 0.03125, %v406_v30 }
 0x277   : > { %v408_v32 = vadd.f32 1e-12, %v407_v31 }
 0x279   : > { %3394 = vrsqrt.f32 %v408_v32 }
 0x286   : > { %v3395_v38 = vpop.eup %3394 }
 0x287   : > { %v410_v39 = vmul.f32 %v3395_v38, %v402_v25 }
 0x289   : > { %v415_v41 = vmul.f32 %v3673_v37, %v410_v39 }
 0x28b   : > { %v3680_v42 = vadd.f32 %v3676_v40, %v415_v41 }
 0x28d   : > { %v453_v44 = vpack.c.bf16 %v3680_v42, %v3680_v42 }
 0x28f   : > { %3058 = vmatmul.mubr.msk.bf16.vlgmr.msra.gmra.mxu1 %vm396_vm3, %v453_v44 }
 0x290   : > { %3062 = vmatpush3.bf16.msra.mxu1 %v3366_v43  ;;  %3065 = vmatprep.mubr.msk.bf16.mxu1 %vm3509_vm0, %v3508_v2 }
 0x291   : > { %3063 = vmatprep.subr.bf16.mxu1 %v3508_v2 }
 0x294   : > { %3064 = vmatpush3.bf16.msra.mxu1 %v3367_v45 }
 0x295   : > { %3069 = vmatprep.subr.bf16.mxu1 %v3508_v2 }
 0x297   : > { %3066 = vmatmul.mubr.msk.bf16.vlgmr.msra.gmra.mxu1 %vm396_vm3, %v453_v44 }
 0x298   : > { %3070 = vmatpush3.bf16.msra.mxu1 %v3368_v46  ;;  %3073 = vmatprep.mubr.msk.bf16.mxu1 %vm3509_vm0, %v3508_v2 }
 0x299   : > { %3071 = vmatprep.subr.bf16.mxu1 %v3508_v2 }
 0x29c   : > { %3072 = vmatpush3.bf16.msra.mxu1 %v3369_v47 }
 0x29d   : > { %3077 = vmatprep.subr.bf16.mxu1 %v3508_v2 }
 0x29f   : > { %3074 = vmatmul.mubr.msk.bf16.vlgmr.msra.gmra.mxu1 %vm396_vm3, %v453_v44 }
 0x2a0   : > { %3078 = vmatpush3.bf16.msra.mxu1 %v3370_v48  ;;  %3081 = vmatprep.mubr.msk.bf16.mxu1 %vm3509_vm0, %v3508_v2 }
 0x2a1   : > { %3079 = vmatprep.subr.bf16.mxu1 %v3508_v2 }
 0x2a4   : > { %3080 = vmatpush3.bf16.msra.mxu1 %v3371_v49 }
 0x2a5   : > { %3091 = vmatprep.subr.bf16.mxu1 %v3508_v2 }
 0x2a7   : > { %3082 = vmatmul.mubr.msk.bf16.vlgmr.msra.gmra.mxu1 %vm396_vm3, %v453_v44 }
 0x2a8   : > { %3093 = vmatprep.mubr.msk.bf16.mxu1 %vm3509_vm0, %v3508_v2 }
 0x34f   : > { %v548_v59 = vpop.f32.mrf.mxu1 }
 0x350   : > { %v549_v60 = vadd.f32 %v548_v59, %v482_v57 }
 0x351   : > { %v3059_v62 = vpop.f32.mrf.mxu1 }
 0x352   : > { %v3733_v63 = vpack.c.bf16 %v549_v60, %v549_v60 }
 0x353   : > { %v551_v0 = vpop.f32.mrf.mxu1 }
 0x354   : > { %715 = vrot.lane.b32.xlu1 %v3733_v63, %s3512_s14 }
 0x355   : > { %v3060_v3 = vpop.f32.mrf.mxu1 }
 0x357   : > { %v600_v4 = vpop.f32.mrf.mxu1 }
 0x358   : > { %v601_v5 = vadd.f32 %v600_v4, %v486_v1 }
 0x359   : > { %v3067_v7 = vpop.f32.mrf.mxu1 }
 0x35a   : > { %v711_v8 = vpack.c.bf16 %v601_v5, %v601_v5 }
 0x35b   : > { %v603_v9 = vpop.f32.mrf.mxu1 }
 0x35c   : > { %765 = vrot.lane.b32.xlu1 %v711_v8, %s3512_s14 }
 0x35d   : > { %v3068_v11 = vpop.f32.mrf.mxu1 }
 0x35f   : > { %v652_v12 = vpop.f32.mrf.mxu1 }
 0x360   : > { %v653_v13 = vadd.f32 %v652_v12, %v490_v10 }
 0x361   : > { %v3075_v15 = vpop.f32.mrf.mxu1 }
 0x362   : > { %v3740_v16 = vpack.c.bf16 %v653_v13, %v653_v13 }
 0x363   : > { %v655_v17 = vpop.f32.mrf.mxu1 }
 0x364   : > { %814 = vrot.lane.b32.xlu1 %v3740_v16, %s3512_s14 }
 0x365   : > { %v3076_v19 = vpop.f32.mrf.mxu1 }
 0x367   : > { %v704_v20 = vpop.f32.mrf.mxu1 }
 0x368   : > { %v705_v21 = vadd.f32 %v704_v20, %v494_v18 }
 0x369   : > { %v3083_v22 = vpop.f32.mrf.mxu1 }
 0x36a   : > { %v713_v23 = vpack.c.bf16 %v705_v21, %v705_v21 }
 0x36b   : > { %v707_v24 = vpop.f32.mrf.mxu1 }
 0x36c   : > { %863 = vrot.lane.b32.xlu1 %v713_v23, %s3512_s14 }
 0x36d   : > { %v3084_v25 = vpop.f32.mrf.mxu1 }
 0x3c6   : > { %v716_v26 = vpop.permute.xlu1 %715 }
 0x3c7   : > { %v722_v27 = vsel %vm717_vm4, %v716_v26, 0 }
 0x3c8   : > { %3086 = vmatpush3.bf16.xpose.msra.mxu0 %v722_v27 }
 0x3c9   : > { %3097 = vmatprep.subr.bf16.mxu0 %v3508_v2 }
 0x3ce   : > { %v766_v28 = vpop.permute.xlu1 %765 }
 0x3cf   : > { %v771_v29 = vsel %vm717_vm4, %v766_v28, 0  ;;  %3088 = vmatmul.mubr.msk.bf16.vlgmr.msra.gmra.mxu0 %vm717_vm4, %v3733_v63 }
 0x3d0   : > { %3092 = vmatpush3.bf16.xpose.msra.mxu1 %v771_v29  ;;  %3099 = vmatprep.mubr.msk.bf16.mxu0 %vm3509_vm0, %v3508_v2 }
 0x3d1   : > { %3103 = vmatprep.subr.bf16.mxu1 %v3508_v2 }
 0x3d6   : > { %v815_v30 = vpop.permute.xlu1 %814 }
 0x3d7   : > { %v820_v31 = vsel %vm717_vm4, %v815_v30, 0  ;;  %3094 = vmatmul.mubr.msk.bf16.vlgmr.msra.gmra.mxu1 %vm717_vm4, %v711_v8 }
 0x3d8   : > { %3098 = vmatpush3.bf16.xpose.msra.mxu0 %v820_v31  ;;  %3105 = vmatprep.mubr.msk.bf16.mxu1 %vm3509_vm0, %v3508_v2 }
 0x3d9   : > { %3109 = vmatprep.subr.bf16.mxu0 %v3508_v2 }
 0x3de   : > { %v864_v32 = vpop.permute.xlu1 %863 }
 0x3df   : > { %v869_v35 = vsel %vm717_vm4, %v864_v32, 0  ;;  %3100 = vmatmul.mubr.msk.bf16.vlgmr.msra.gmra.mxu0 %vm717_vm4, %v3740_v16 }
 0x3e0   : > { %3104 = vmatpush3.bf16.xpose.msra.mxu1 %v869_v35  ;;  %3111 = vmatprep.mubr.msk.bf16.mxu0 %vm3509_vm0, %v3508_v2 }
 0x3e1   : > { %3115 = vmatprep.subr.bf16.mxu1 %v3508_v2 }
 0x3e7   : > { %3106 = vmatmul.mubr.msk.bf16.vlgmr.msra.gmra.mxu1 %vm717_vm4, %v713_v23 }
 0x3e8   : > { %3117 = vmatprep.mubr.msk.bf16.mxu1 %vm3509_vm0, %v3508_v2 }
 0x48f   : > { %v758_v38 = vpop.f32.mrf.mxu0 }
 0x490   : > { %v911_v39 = vsel %vm717_vm4, %v758_v38, -inf }
 0x491   : > { %912 = vmax.xlane.f32.xlu1 %v911_v39  ;;  %v3089_v41 = vpop.f32.mrf.mxu0 }
 0x493   : > { %v761_v43 = vpop.f32.mrf.mxu0 }
 0x495   : > { %v3090_v44 = vpop.f32.mrf.mxu0 }
 0x497   : > { %v807_v45 = vpop.f32.mrf.mxu1 }
 0x498   : > { %v914_v46 = vsel %vm717_vm4, %v807_v45, -inf }
 0x499   : > { %915 = vmax.xlane.f32.xlu0 %v914_v46  ;;  %v3095_v47 = vpop.f32.mrf.mxu1 }
 0x49b   : > { %v810_v48 = vpop.f32.mrf.mxu1 }
 0x49d   : > { %v3096_v49 = vpop.f32.mrf.mxu1 }
 0x49e   : > { %v437_v49 = vld [vmem:[%s4187_s4] sm:$0xf] }
 0x49f   : > { %v856_v50 = vpop.f32.mrf.mxu0 }
 0x4a0   : > { %v917_v51 = vsel %vm717_vm4, %v856_v50, -inf }
 0x4a1   : > { %918 = vmax.xlane.f32.xlu0 %v917_v51  ;;  %v3101_v52 = vpop.f32.mrf.mxu0  ;;  %v438_v51 = vld [vmem:[%s4187_s4 + $0x4] sm:$0xf] }
 0x4a2   : > { %1008 = vrot.lane.b32.xlu1 %v711_v8, %s3513_s15  ;;  %v1206_v52 = vsel %vm964_vm5, %v438_v51, 0 }
 0x4a3   : > { %v859_v55 = vpop.f32.mrf.mxu0 }
 0x4a4   : > { %v439_v55 = vld [vmem:[%s4187_s4 + $0x8] sm:$0xf] }
 0x4a5   : > { %v3102_v56 = vpop.f32.mrf.mxu0 }
 0x4a6   : > { %1104 = vrot.lane.b32.xlu1 %v713_v23, %s3513_s15 }
 0x4a7   : > { %v905_v57 = vpop.f32.mrf.mxu1 }
 0x4a8   : > { %v920_v58 = vsel %vm717_vm4, %v905_v57, -inf }
 0x4a9   : > { %v3107_v59 = vpop.f32.mrf.mxu1  ;;  %921 = vmax.xlane.f32.xlu0 %v920_v58  ;;  %v1252_v58 = vsel %vm964_vm5, %v439_v55, 0 }
 0x4ab   : > { %v908_v60 = vpop.f32.mrf.mxu1 }
 0x4ad   : > { %v3108_v61 = vpop.f32.mrf.mxu1 }
 0x4bf   : > { %959 = vrot.lane.b32.xlu0 %v3733_v63, %s3513_s15 }
 0x51a   : > { %v913_v62 = vpop.xlane.xlu1 %912 }
 0x51b   : > { %v923_v0 = vsub.f32 %v758_v38, %v913_v62  ;;  %v440_v62 = vld [vmem:[%s4187_s4 + $0xc] sm:$0xf] }
 0x51d   : > { %v927_v1 = vmul.f32 1.442695, %v923_v0 }
 0x51e   : > { %v1009_v3 = vpop.permute.xlu1 %1008 }
 0x51f   : > { %3396 = vpow2.f32 %v927_v1  ;;  %v1014_v4 = vsel %vm964_vm5, %v1009_v3, 0  ;;  %v1298_v3 = vsel %vm964_vm5, %v440_v62, 0  ;;  %v1373_v62 = vsub.s32 6, %v3661_v33 }
 0x520   : > { %3116 = vmatpush3.bf16.msra.mxu1 %v1014_v4 }
 0x521   : > { %3127 = vmatprep.subr.bf16.mxu1 %v3508_v2 }
 0x522   : > { %v916_v5 = vpop.xlane.xlu0 %915  ;;  %v1105_v32 = vpop.permute.xlu1 %1104 }
 0x523   : > { %v924_v6 = vsub.f32 %v807_v45, %v916_v5  ;;  %v1110_v38 = vsel %vm964_vm5, %v1105_v32, 0 }
 0x525   : > { %v929_v7 = vmul.f32 1.442695, %v924_v6 }
 0x527   : > { %3398 = vpow2.f32 %v929_v7 }
 0x52a   : > { %v919_v8 = vpop.xlane.xlu0 %918 }
 0x52b   : > { %v925_v9 = vsub.f32 %v856_v50, %v919_v8  ;;  %v1160_v50 = vsel %vm964_vm5, %v437_v49, 0 }
 0x52c   : > { %v3397_v10 = vpop.eup %3396 }
 0x52d   : > { %v931_v11 = vmul.f32 1.442695, %v925_v9  ;;  %v935_v63 = vsel %vm717_vm4, %v3397_v10, 0.0 }
 0x52e   : > { %936 = vadd.xlane.f32.xlu0 %v935_v63 }
 0x52f   : > { %3400 = vpow2.f32 %v931_v11 }
 0x532   : > { %v922_v12 = vpop.xlane.xlu0 %921 }
 0x533   : > { %v926_v13 = vsub.f32 %v905_v57, %v922_v12 }
 0x534   : > { %v3399_v14 = vpop.eup %3398 }
 0x535   : > { %v933_v15 = vmul.f32 1.442695, %v926_v13  ;;  %v938_v17 = vsel %vm717_vm4, %v3399_v14, 0.0 }
 0x536   : > { %939 = vadd.xlane.f32.xlu0 %v938_v17  ;;  %v960_v18 = vpop.permute.xlu0 %959 }
 0x537   : > { %3402 = vpow2.f32 %v933_v15  ;;  %v966_v19 = vsel %vm964_vm5, %v960_v18, 0 }
 0x538   : > { %3110 = vmatpush3.bf16.msra.mxu0 %v966_v19 }
 0x539   : > { %3121 = vmatprep.subr.bf16.mxu0 %v3508_v2 }
 0x53c   : > { %v3401_v20 = vpop.eup %3400 }
 0x53d   : > { %v941_v21 = vsel %vm717_vm4, %v3401_v20, 0.0 }
 0x53e   : > { %942 = vadd.xlane.f32.xlu0 %v941_v21 }
 0x544   : > { %v3403_v22 = vpop.eup %3402 }
 0x545   : > { %v944_v23 = vsel %vm717_vm4, %v3403_v22, 0.0 }
 0x546   : > { %945 = vadd.xlane.f32.xlu0 %v944_v23 }
 0x55c   : > { %1056 = vrot.lane.b32.xlu0 %v3740_v16, %s3513_s15 }
 0x5b7   : > { %v937_v24 = vpop.xlane.xlu0 %936 }
 0x5b8   : > { %3404 = vrcp.f32 %v937_v24 }
 0x5bf   : > { %v940_v25 = vpop.xlane.xlu0 %939 }
 0x5c0   : > { %3406 = vrcp.f32 %v940_v25 }
 0x5c5   : > { %v3405_v26 = vpop.eup %3404 }
 0x5c6   : > { %v951_v27 = vmul.f32 %v3405_v26, %v3397_v10 }
 0x5c7   : > { %v943_v28 = vpop.xlane.xlu0 %942 }
 0x5c8   : > { %3408 = vrcp.f32 %v943_v28  ;;  %v955_v29 = vpack.c.bf16 %v951_v27, %v951_v27 }
 0x5ca   : > { %3112 = vmatmul.mubr.msk.bf16.vlgmr.msra.gmra.mxu0 %vm717_vm4, %v955_v29  ;;  %v1349_v29 = vsub.s32 4, %v3661_v33 }
 0x5cb   : > { %3123 = vmatprep.mubr.msk.bf16.mxu0 %vm3509_vm0, %v3508_v2 }
 0x5cd   : > { %v3407_v30 = vpop.eup %3406 }
 0x5ce   : > { %v952_v31 = vmul.f32 %v3407_v30, %v3399_v14 }
 0x5cf   : > { %v946_v35 = vpop.xlane.xlu0 %945 }
 0x5d0   : > { %3410 = vrcp.f32 %v946_v35  ;;  %v956_v16 = vpack.c.bf16 %v952_v31, %v952_v31 }
 0x5d2   : > { %3118 = vmatmul.mubr.msk.bf16.vlgmr.msra.gmra.mxu1 %vm717_vm4, %v956_v16 }
 0x5d3   : > { %3128 = vmatpush3.bf16.msra.mxu1 %v1110_v38  ;;  %v1057_v39 = vpop.permute.xlu0 %1056  ;;  %3129 = vmatprep.mubr.msk.bf16.mxu1 %vm3509_vm0, %v3508_v2 }
 0x5d4   : > { %v1062_v41 = vsel %vm964_vm5, %v1057_v39, 0  ;;  %3139 = vmatprep.subr.bf16.mxu1 %v3508_v2  ;;  %v1350_v39 = vrot.slane %v3726_v54, %v1349_v29 }
 0x5d5   : > { %v3409_v43 = vpop.eup %3408  ;;  %3122 = vmatpush3.bf16.msra.mxu0 %v1062_v41 }
 0x5d6   : > { %v953_v44 = vmul.f32 %v3409_v43, %v3401_v20  ;;  %3133 = vmatprep.subr.bf16.mxu0 %v3508_v2 }
 0x5d8   : > { %v957_v45 = vpack.c.bf16 %v953_v44, %v953_v44 }
 0x5da   : > { %3124 = vmatmul.mubr.msk.bf16.vlgmr.msra.gmra.mxu0 %vm717_vm4, %v957_v45 }
 0x5db   : > { %3135 = vmatprep.mubr.msk.bf16.mxu0 %vm3509_vm0, %v3508_v2  ;;  %3134 = vmatpush3.bf16.msra.mxu0 %v1160_v50 }
 0x5dc   : > { %3145 = vmatprep.subr.bf16.mxu0 %v3508_v2 }
 0x5dd   : > { %v3411_v46 = vpop.eup %3410 }
 0x5de   : > { %v954_v47 = vmul.f32 %v3411_v46, %v3403_v22 }
 0x5e0   : > { %v958_v48 = vpack.c.bf16 %v954_v47, %v954_v47 }
 0x5e2   : > { %3130 = vmatmul.mubr.msk.bf16.vlgmr.msra.gmra.mxu1 %vm717_vm4, %v958_v48 }
 0x5e3   : > { %3141 = vmatprep.mubr.msk.bf16.mxu1 %vm3509_vm0, %v3508_v2  ;;  %3140 = vmatpush3.bf16.msra.mxu1 %v1206_v52 }
 0x5e4   : > { %3151 = vmatprep.subr.bf16.mxu1 %v3508_v2 }
 0x68a   : > { %v1002_v56 = vpop.f32.mrf.mxu0 }
 0x68b   : > { %v1152_v57 = vpack.c.bf16 %v1002_v56, %v1002_v56 }
 0x68c   : > { %v3113_v59 = vpop.f32.mrf.mxu0 }
 0x68d   : > { %3136 = vmatmul.mubr.msk.bf16.vlgmr.msra.gmra.mxu0 %vm717_vm4, %v1152_v57  ;;  %v3372_v57 = vld [vmem:[%s4188_s5 + $0x8] sm:$0xff]  }
 0x68e   : > { %v1005_v60 = vpop.f32.mrf.mxu0  ;;  %3146 = vmatpush3.bf16.msra.mxu0 %v1252_v58  ;;  %3147 = vmatprep.mubr.msk.bf16.mxu0 %vm3509_vm0, %v3508_v2  ;;  %v3373_v58 = vld [vmem:[%s4188_s5] sm:$0xff]  }
 0x68f   : > { %3157 = vmatprep.subr.bf16.mxu0 %v3508_v2 }
 0x690   : > { %v3114_v61 = vpop.f32.mrf.mxu0 }
 0x691   : > { %v1368_v61 = vsub.s32 5, %v3661_v33 }
 0x692   : > { %v1050_v0 = vpop.f32.mrf.mxu1 }
 0x693   : > { %v1153_v1 = vpack.c.bf16 %v1050_v0, %v1050_v0  ;;  %v1369_v0 = vrot.slane %v3726_v54, %v1368_v61 }
 0x694   : > { %v3119_v4 = vpop.f32.mrf.mxu1 }
 0x695   : > { %3142 = vmatmul.mubr.msk.bf16.vlgmr.msra.gmra.mxu1 %vm717_vm4, %v1153_v1  ;;  %v1374_v4 = vrot.slane %v3726_v54, %v1373_v62 }
 0x696   : > { %v1053_v5 = vpop.f32.mrf.mxu1  ;;  %3152 = vmatpush3.bf16.msra.mxu1 %v1298_v3  ;;  %3153 = vmatprep.mubr.msk.bf16.mxu1 %vm3509_vm0, %v3508_v2 }
 0x697   : > { %3165 = vmatprep.subr.bf16.mxu1 %v3508_v2 }
 0x698   : > { %v3120_v6 = vpop.f32.mrf.mxu1 }
 0x69a   : > { %v1098_v7 = vpop.f32.mrf.mxu0 }
 0x69b   : > { %v1154_v8 = vpack.c.bf16 %v1098_v7, %v1098_v7 }
 0x69c   : > { %v3125_v9 = vpop.f32.mrf.mxu0 }
 0x69d   : > { %3148 = vmatmul.mubr.msk.bf16.vlgmr.msra.gmra.mxu0 %vm717_vm4, %v1154_v8  ;;  %v3374_v8 = vld [vmem:[%s4188_s5 + $0x28] sm:$0xff]   ;;  %v3375_v9 = vld [vmem:[%s4188_s5 + $0x20] sm:$0xff]  }
 0x69e   : > { %v1101_v10 = vpop.f32.mrf.mxu0  ;;  %3161 = vmatprep.mubr.msk.bf16.mxu0 %vm3509_vm0, %v3508_v2  ;;  %3158 = vmatpush3.bf16.msra.mxu0 %v3372_v57 }
 0x69f   : > { %3159 = vmatprep.subr.bf16.mxu0 %v3508_v2  ;;  %v3376_v10 = vld [vmem:[%s4188_s5 + $0x18] sm:$0xff]  }
 0x6a0   : > { %v3126_v11 = vpop.f32.mrf.mxu0 }
 0x6a1   : > { %v3377_v11 = vld [vmem:[%s4188_s5 + $0x10] sm:$0xff]  }
 0x6a2   : > { %v1146_v63 = vpop.f32.mrf.mxu1  ;;  %3160 = vmatpush3.bf16.msra.mxu0 %v3373_v58 }
 0x6a3   : > { %v1155_v12 = vpack.c.bf16 %v1146_v63, %v1146_v63  ;;  %3177 = vmatprep.subr.bf16.mxu0 %v3508_v2  ;;  %v1379_v63 = vsub.s32 7, %v3661_v33 }
 0x6a4   : > { %v3131_v13 = vpop.f32.mrf.mxu1 }
 0x6a5   : > { %3154 = vmatmul.mubr.msk.bf16.vlgmr.msra.gmra.mxu1 %vm717_vm4, %v1155_v12  ;;  %v1380_v12 = vrot.slane %v3726_v54, %v1379_v63  ;;  %v276_v54 = vld [vmem:[%s4184_s1 + $0x8] sm:$0xff] }
 0x6a6   : > { %v1149_v14 = vpop.f32.mrf.mxu1  ;;  %3173 = vmatprep.mubr.msk.bf16.mxu1 %vm3509_vm0, %v3508_v2  ;;  %3166 = vmatpush3.bf16.msra.mxu1 %v3374_v8 }
 0x6a7   : > { %3167 = vmatprep.subr.bf16.mxu1 %v3508_v2 }
 0x6a8   : > { %v3132_v15 = vpop.f32.mrf.mxu1 }
 0x6aa   : > { %3168 = vmatpush3.bf16.msra.mxu1 %v3375_v9 }
 0x6ab   : > { %3169 = vmatprep.subr.bf16.mxu1 %v3508_v2 }
 0x6ae   : > { %3170 = vmatpush3.bf16.msra.mxu1 %v3376_v10 }
 0x6af   : > { %3171 = vmatprep.subr.bf16.mxu1 %v3508_v2 }
 0x6b2   : > { %3172 = vmatpush3.bf16.msra.mxu1 %v3377_v11 }
 0x6b3   : > { %3193 = vmatprep.subr.bf16.mxu1 %v3508_v2 }
 0x74d   : > { %v1196_v17 = vpop.f32.mrf.mxu0 }
 0x74e   : > { %v1340_v30 = vsel %vm396_vm3, %v1196_v17, 0.0 }
 0x74f   : > { %v3137_v18 = vpop.f32.mrf.mxu0 }
 0x751   : > { %v1199_v19 = vpop.f32.mrf.mxu0 }
 0x753   : > { %v3138_v20 = vpop.f32.mrf.mxu0 }
 0x755   : > { %v1242_v21 = vpop.f32.mrf.mxu1 }
 0x756   : > { %v1341_v27 = vsel %vm396_vm3, %v1242_v21, 0.0 }
 0x757   : > { %v3143_v22 = vpop.f32.mrf.mxu1  ;;  %v1342_v32 = vadd.f32 %v1341_v27, %v1340_v30 }
 0x759   : > { %v1245_v23 = vpop.f32.mrf.mxu1 }
 0x75b   : > { %v3144_v24 = vpop.f32.mrf.mxu1 }
 0x75d   : > { %v1288_v25 = vpop.f32.mrf.mxu0 }
 0x75e   : > { %v1343_v31 = vsel %vm396_vm3, %v1288_v25, 0.0  ;;  %v1445_v25 = vrot.slane %v276_v54, %v3664_v34 }
 0x75f   : > { %v3149_v26 = vpop.f32.mrf.mxu0  ;;  %v1344_v16 = vadd.f32 %v1343_v31, %v1342_v32 }
 0x761   : > { %v1291_v28 = vpop.f32.mrf.mxu0 }
 0x763   : > { %v3150_v35 = vpop.f32.mrf.mxu0 }
 0x765   : > { %v1334_v38 = vpop.f32.mrf.mxu1 }
 0x766   : > { %v1345_v41 = vsel %vm396_vm3, %v1334_v38, 0.0 }
 0x767   : > { %v1346_v43 = vadd.f32 %v1345_v41, %v1344_v16  ;;  %v3155_v44 = vpop.f32.mrf.mxu1 }
 0x768   : > { %v3378_v44 = vld [vmem:[%s4186_s3 + $0x48] sm:$0xff]  }
 0x769   : > { %v1351_v45 = vadd.f32 %v1350_v39, %v1346_v43  ;;  %v1337_v46 = vpop.f32.mrf.mxu1 }
 0x76a   : > { %v3380_v46 = vld [vmem:[%s4186_s3 + $0x40] sm:$0xff]  }
 0x76b   : > { %v3156_v47 = vpop.f32.mrf.mxu1  ;;  %v1352_v48 = vadd.f32 %v1351_v45, %v3680_v42  ;;  %v3379_v45 = vld [vmem:[%s4186_s3 + $0x68] sm:$0xff]  }
 0x76c   : > { %v3381_v47 = vld [vmem:[%s4186_s3 + $0x60] sm:$0xff]  }
 0x76d   : > { %v1353_v49 = vsel %vm396_vm3, %v1352_v48, 0.0 }
 0x76e   : > { %1354 = vadd.xlane.f32.xlu0 %v1353_v49 }
 0x7f7   : > { %v1355_v50 = vpop.xlane.xlu0 %1354 }
 0x7f8   : > { %v1356_v51 = vmul.f32 0.03125, %v1355_v50 }
 0x7fa   : > { %v1357_v52 = vsub.f32 %v1352_v48, %v1356_v51  ;;  %v3910_v51 = vsub.s32 2, %v3661_v33  ;;  %v278_v33 = vld [vmem:[%s4184_s1 + $0x18] sm:$0xff] }
 0x7fc   : > { %v1358_v55 = vmul.f32 %v1357_v52, %v1357_v52 }
 0x7fe   : > { %v1359_v56 = vsel %vm396_vm3, %v1358_v55, 0.0 }
 0x7ff   : > { %1360 = vadd.xlane.f32.xlu1 %v1359_v56  ;;  %v1536_v56 = vrot.slane %v276_v54, %v3910_v51 }
 0x888   : > { %v1361_v42 = vpop.xlane.xlu1 %1360 }
 0x889   : > { %v1362_v59 = vmul.f32 0.03125, %v1361_v42 }
 0x88b   : > { %v1363_v60 = vadd.f32 1e-12, %v1362_v59  ;;  %v3382_v59 = vld [vmem:[%s4186_s3 + $0x58] sm:$0xff]  }
 0x88d   : > { %3412 = vrsqrt.f32 %v1363_v60 }
 0x89a   : > { %v3413_v1 = vpop.eup %3412 }
 0x89b   : > { %v1365_v3 = vmul.f32 %v3413_v1, %v1357_v52  ;;  %v1531_v52 = vrot.slane %v276_v54, %v3670_v36  ;;  %v3384_v1 = vld [vmem:[%s4186_s3 + $0x78] sm:$0xff]  }
 0x89d   : > { %v1370_v5 = vmul.f32 %v1369_v0, %v1365_v3  ;;  %v3383_v0 = vld [vmem:[%s4186_s3 + $0x50] sm:$0xff]  }
 0x89e   : > { %v3385_v3 = vld [vmem:[%s4186_s3 + $0x70] sm:$0xff]  }
 0x89f   : > { %v1375_v6 = vadd.f32 %v1374_v4, %v1370_v5  ;;  %v3949_v4 = vld [vmem:[%s4184_s1 + $0x10] sm:$0xff] }
 0x8a0   : > { %v1581_v5 = vrot.slane %v3949_v4, %v3721_v53 }
 0x8a1   : > { %v1376_v7 = vpack.c.bf16 %v1375_v6, %v1375_v6 }
 0x8a2   : > { %v1582_v9 = vcombine.high %v1581_v5, %v1581_v5 }
 0x8a3   : > { %3162 = vmatmul.mubr.msk.bf16.vlgmr.msra.gmra.mxu0 %vm396_vm3, %v1376_v7 }
 0x8a4   : > { %3181 = vmatprep.mubr.msk.bf16.mxu0 %vm3509_vm0, %v3508_v2  ;;  %3178 = vmatpush3.bf16.msra.mxu0 %v3378_v44 }
 0x8a5   : > { %3179 = vmatprep.subr.bf16.mxu0 %v3508_v2 }
 0x8a8   : > { %3180 = vmatpush3.bf16.msra.mxu0 %v3380_v46 }
 0x8a9   : > { %3185 = vmatprep.subr.bf16.mxu0 %v3508_v2 }
 0x963   : > { %v1430_v13 = vpop.f32.mrf.mxu0 }
 0x964   : > { %v1431_v14 = vadd.f32 %v1430_v13, %v1380_v12 }
 0x965   : > { %v3163_v15 = vpop.f32.mrf.mxu0 }
 0x966   : > { %v1437_v17 = vmul.f32 0.70710677, %v1431_v14  ;;  %v1436_v21 = vmul.f32 0.5, %v1431_v14  ;;  %v1596_v14 = vrot.slane %v1582_v9, %v3721_v53 }
 0x967   : > { %v1433_v18 = vpop.f32.mrf.mxu0 }
 0x968   : > { %3414 = verf.f32 %v1437_v17 }
 0x969   : > { %v3164_v19 = vpop.f32.mrf.mxu0 }
 0x975   : > { %v3415_v20 = vpop.eup %3414 }
 0x976   : > { %v1439_v22 = vadd.f32 1.0, %v3415_v20 }
 0x978   : > { %v1440_v23 = vmul.f32 %v1439_v22, %v1436_v21  ;;  %v1606_v22 = vrot.slane %v1596_v14, %v3664_v34 }
 0x97a   : > { %v1441_v24 = vpack.c.bf16 %v1440_v23, %v1440_v23 }
 0x97c   : > { %3174 = vmatmul.mubr.msk.bf16.vlgmr.msra.gmra.mxu1 %vm1470_vm6, %v1441_v24 }
 0x97d   : > { %3197 = vmatprep.mubr.msk.bf16.mxu1 %vm3509_vm0, %v3508_v2  ;;  %3194 = vmatpush3.bf16.msra.mxu1 %v3379_v45 }
 0x97e   : > { %3195 = vmatprep.subr.bf16.mxu1 %v3508_v2 }
 0x981   : > { %3196 = vmatpush3.bf16.msra.mxu1 %v3381_v47 }
 0x982   : > { %3209 = vmatprep.subr.bf16.mxu1 %v3508_v2 }
 0xa3c   : > { %v1508_v26 = vpop.f32.mrf.mxu1 }
 0xa3d   : > { %v1509_v27 = vadd.f32 %v1508_v26, %v1445_v25 }
 0xa3e   : > { %v3175_v28 = vpop.f32.mrf.mxu1 }
 0xa3f   : > { %v1514_v30 = vadd.f32 %v1509_v27, %v1375_v6  ;;  %v1589_v6 = vrot.slane %v1581_v5, %v3721_v53  ;;  %v1598_v53 = vcombine.high %v1596_v14, %v1596_v14 }
 0xa40   : > { %v1511_v31 = vpop.f32.mrf.mxu1 }
 0xa41   : > { %v1515_v32 = vsel %vm396_vm3, %v1514_v30, 0.0  ;;  %v1597_v7 = vcombine.high %v1589_v6, %v1589_v6  ;;  %v1602_v8 = vrot.slane %v1589_v6, %v3664_v34  ;;  %v1614_v31 = vrot.slane %v1598_v53, %v3664_v34 }
 0xa42   : > { %1516 = vadd.xlane.f32.xlu0 %v1515_v32  ;;  %v3176_v35 = vpop.f32.mrf.mxu1 }
 0xa43   : > { %v1610_v10 = vrot.slane %v1597_v7, %v3664_v34 }
 0xacb   : > { %v1517_v16 = vpop.xlane.xlu0 %1516 }
 0xacc   : > { %v1518_v38 = vmul.f32 0.03125, %v1517_v16 }
 0xace   : > { %v1519_v39 = vsub.f32 %v1514_v30, %v1518_v38 }
 0xad0   : > { %v1520_v41 = vmul.f32 %v1519_v39, %v1519_v39 }
 0xad2   : > { %v1521_v43 = vsel %vm396_vm3, %v1520_v41, 0.0 }
 0xad3   : > { %1522 = vadd.xlane.f32.xlu0 %v1521_v43 }
 0xb5c   : > { %v1523_v48 = vpop.xlane.xlu0 %1522 }
 0xb5d   : > { %v1524_v49 = vmul.f32 0.03125, %v1523_v48 }
 0xb5f   : > { %v1525_v50 = vadd.f32 1e-12, %v1524_v49 }
 0xb61   : > { %3416 = vrsqrt.f32 %v1525_v50 }
 0xb6e   : > { %v3417_v55 = vpop.eup %3416 }
 0xb6f   : > { %v1527_v57 = vmul.f32 %v3417_v55, %v1519_v39 }
 0xb71   : > { %v1532_v58 = vmul.f32 %v1531_v52, %v1527_v57 }
 0xb73   : > { %v3914_v42 = vadd.f32 %v1536_v56, %v1532_v58 }
 0xb75   : > { %v1573_v60 = vpack.c.bf16 %v3914_v42, %v3914_v42 }
 0xb77   : > { %3182 = vmatmul.mubr.msk.bf16.vlgmr.msra.gmra.mxu0 %vm396_vm3, %v1573_v60  ;;  %3198 = vmatmul.mubr.msk.bf16.vlgmr.msra.gmra.mxu1 %vm396_vm3, %v1573_v60 }
 0xb78   : > { %3186 = vmatpush3.bf16.msra.mxu0 %v3382_v59  ;;  %3189 = vmatprep.mubr.msk.bf16.mxu0 %vm3509_vm0, %v3508_v2 }
 0xb79   : > { %3187 = vmatprep.subr.bf16.mxu0 %v3508_v2  ;;  %3211 = vmatprep.mubr.msk.bf16.mxu1 %vm3509_vm0, %v3508_v2 }
 0xb7c   : > { %3188 = vmatpush3.bf16.msra.mxu0 %v3383_v0 }
 0xb7d   : > { %3201 = vmatprep.subr.bf16.mxu0 %v3508_v2 }
 0xb7f   : > { %3190 = vmatmul.mubr.msk.bf16.vlgmr.msra.gmra.mxu0 %vm396_vm3, %v1573_v60 }
 0xb80   : > { %3202 = vmatpush3.bf16.msra.mxu0 %v3384_v1  ;;  %3205 = vmatprep.mubr.msk.bf16.mxu0 %vm3509_vm0, %v3508_v2 }
 0xb81   : > { %3203 = vmatprep.subr.bf16.mxu0 %v3508_v2 }
 0xb84   : > { %3204 = vmatpush3.bf16.msra.mxu0 %v3385_v3 }
 0xb85   : > { %3215 = vmatprep.subr.bf16.mxu0 %v3508_v2 }
 0xb87   : > { %3206 = vmatmul.mubr.msk.bf16.vlgmr.msra.gmra.mxu0 %vm396_vm3, %v1573_v60 }
 0xb88   : > { %3217 = vmatprep.mubr.msk.bf16.mxu0 %vm3509_vm0, %v3508_v2 }
 0xc37   : > { %v1668_v11 = vpop.f32.mrf.mxu0  ;;  %v1772_v12 = vpop.f32.mrf.mxu1 }
 0xc38   : > { %v1669_v13 = vadd.f32 %v1668_v11, %v1602_v8  ;;  %v1773_v19 = vadd.f32 %v1772_v12, %v1610_v10 }
 0xc39   : > { %v3183_v15 = vpop.f32.mrf.mxu0  ;;  %v3199_v17 = vpop.f32.mrf.mxu1 }
 0xc3a   : > { %v3957_v18 = vpack.c.bf16 %v1669_v13, %v1669_v13  ;;  %v3962_v54 = vpack.c.bf16 %v1773_v19, %v1773_v19 }
 0xc3b   : > { %v1671_v20 = vpop.f32.mrf.mxu0  ;;  %v1775_v21 = vpop.f32.mrf.mxu1 }
 0xc3c   : > { %1835 = vrot.lane.b32.xlu1 %v3957_v18, %s3512_s14 }
 0xc3d   : > { %v3184_v23 = vpop.f32.mrf.mxu0  ;;  %v3200_v24 = vpop.f32.mrf.mxu1 }
 0xc3f   : > { %v1720_v25 = vpop.f32.mrf.mxu0 }
 0xc40   : > { %v1721_v26 = vadd.f32 %v1720_v25, %v1606_v22  ;;  %1933 = vrot.lane.b32.xlu1 %v3962_v54, %s3512_s14 }
 0xc41   : > { %v3191_v27 = vpop.f32.mrf.mxu0 }
 0xc42   : > { %v3966_v28 = vpack.c.bf16 %v1721_v26, %v1721_v26 }
 0xc43   : > { %v1723_v30 = vpop.f32.mrf.mxu0 }
 0xc44   : > { %1884 = vrot.lane.b32.xlu0 %v3966_v28, %s3512_s14 }
 0xc45   : > { %v3192_v32 = vpop.f32.mrf.mxu0 }
 0xc47   : > { %v1824_v35 = vpop.f32.mrf.mxu0 }
 0xc48   : > { %v1825_v16 = vadd.f32 %v1824_v35, %v1614_v31 }
 0xc49   : > { %v3207_v38 = vpop.f32.mrf.mxu0 }
 0xc4a   : > { %v3971_v39 = vpack.c.bf16 %v1825_v16, %v1825_v16 }
 0xc4b   : > { %v1827_v41 = vpop.f32.mrf.mxu0 }
 0xc4c   : > { %1982 = vrot.lane.b32.xlu1 %v3971_v39, %s3512_s14 }
 0xc4d   : > { %v3208_v43 = vpop.f32.mrf.mxu0 }
 0xcae   : > { %v1836_v44 = vpop.permute.xlu1 %1835 }
 0xcaf   : > { %v1841_v45 = vsel %vm717_vm4, %v1836_v44, 0 }
 0xcb0   : > { %3210 = vmatpush3.bf16.xpose.msra.mxu1 %v1841_v45 }
 0xcb1   : > { %3221 = vmatprep.subr.bf16.mxu1 %v3508_v2 }
 0xcb2   : > { %v1934_v46 = vpop.permute.xlu1 %1933 }
 0xcb3   : > { %v1939_v48 = vsel %vm717_vm4, %v1934_v46, 0 }
 0xcb6   : > { %v1885_v47 = vpop.permute.xlu0 %1884 }
 0xcb7   : > { %v1890_v49 = vsel %vm717_vm4, %v1885_v47, 0  ;;  %3212 = vmatmul.mubr.msk.bf16.vlgmr.msra.gmra.mxu1 %vm717_vm4, %v3957_v18 }
 0xcb8   : > { %3216 = vmatpush3.bf16.xpose.msra.mxu0 %v1890_v49  ;;  %3222 = vmatpush3.bf16.xpose.msra.mxu1 %v1939_v48 }
 0xcb9   : > { %3223 = vmatprep.mubr.msk.bf16.mxu1 %vm3509_vm0, %v3508_v2  ;;  %3227 = vmatprep.subr.bf16.mxu0 %v3508_v2 }
 0xcba   : > { %3233 = vmatprep.subr.bf16.mxu1 %v3508_v2 }
 0xcbe   : > { %v1983_v50 = vpop.permute.xlu1 %1982 }
 0xcbf   : > { %v1988_v52 = vsel %vm717_vm4, %v1983_v50, 0  ;;  %3218 = vmatmul.mubr.msk.bf16.vlgmr.msra.gmra.mxu0 %vm717_vm4, %v3966_v28  ;;  %3224 = vmatmul.mubr.msk.bf16.vlgmr.msra.gmra.mxu1 %vm717_vm4, %v3962_v54 }
 0xcc0   : > { %3228 = vmatpush3.bf16.xpose.msra.mxu0 %v1988_v52  ;;  %3229 = vmatprep.mubr.msk.bf16.mxu0 %vm3509_vm0, %v3508_v2 }
 0xcc1   : > { %3235 = vmatprep.mubr.msk.bf16.mxu1 %vm3509_vm0, %v3508_v2  ;;  %3239 = vmatprep.subr.bf16.mxu0 %v3508_v2 }
 0xcc7   : > { %3230 = vmatmul.mubr.msk.bf16.vlgmr.msra.gmra.mxu0 %vm717_vm4, %v3971_v39 }
 0xcc8   : > { %3241 = vmatprep.mubr.msk.bf16.mxu0 %vm3509_vm0, %v3508_v2 }
 0xd77   : > { %v1877_v55 = vpop.f32.mrf.mxu1 }
 0xd78   : > { %v2030_v56 = vsel %vm717_vm4, %v1877_v55, -inf }
 0xd79   : > { %v3213_v57 = vpop.f32.mrf.mxu1  ;;  %2031 = vmax.xlane.f32.xlu0 %v2030_v56 }
 0xd7b   : > { %v1880_v58 = vpop.f32.mrf.mxu1 }
 0xd7d   : > { %v3214_v59 = vpop.f32.mrf.mxu1 }
 0xd7f   : > { %v1926_v60 = vpop.f32.mrf.mxu0  ;;  %v1975_v0 = vpop.f32.mrf.mxu1 }
 0xd80   : > { %v2036_v1 = vsel %vm717_vm4, %v1975_v0, -inf  ;;  %v2033_v3 = vsel %vm717_vm4, %v1926_v60, -inf }
 0xd81   : > { %v3225_v5 = vpop.f32.mrf.mxu1  ;;  %2037 = vmax.xlane.f32.xlu0 %v2036_v1  ;;  %2034 = vmax.xlane.f32.xlu1 %v2033_v3  ;;  %v3219_v6 = vpop.f32.mrf.mxu0 }
 0xd83   : > { %v1929_v7 = vpop.f32.mrf.mxu0  ;;  %v1978_v8 = vpop.f32.mrf.mxu1 }
 0xd85   : > { %v3220_v9 = vpop.f32.mrf.mxu0  ;;  %v3226_v10 = vpop.f32.mrf.mxu1 }
 0xd86   : > { %v2878_v9 = vld [vmem:[%s4187_s4 + $0x10] sm:$0xf] }
 0xd87   : > { %v2024_v11 = vpop.f32.mrf.mxu0  ;;  %v2278_v10 = vsel %vm964_vm5, %v2878_v9, 0 }
 0xd88   : > { %v2039_v12 = vsel %vm717_vm4, %v2024_v11, -inf }
 0xd89   : > { %2040 = vmax.xlane.f32.xlu0 %v2039_v12  ;;  %v3231_v13 = vpop.f32.mrf.mxu0 }
 0xd8a   : > { %v2880_v13 = vld [vmem:[%s4187_s4 + $0x18] sm:$0xf] }
 0xd8b   : > { %v2027_v14 = vpop.f32.mrf.mxu0 }
 0xd8d   : > { %v3232_v15 = vpop.f32.mrf.mxu0 }
 0xd92   : > { %2078 = vrot.lane.b32.xlu1 %v3957_v18, %s3513_s15 }
 0xe02   : > { %v2032_v17 = vpop.xlane.xlu0 %2031 }
 0xe03   : > { %v2042_v19 = vsub.f32 %v1877_v55, %v2032_v17  ;;  %v2370_v17 = vsel %vm964_vm5, %v2880_v13, 0 }
 0xe05   : > { %v2046_v20 = vmul.f32 1.442695, %v2042_v19 }
 0xe07   : > { %3418 = vpow2.f32 %v2046_v20 }
 0xe0a   : > { %v2038_v21 = vpop.xlane.xlu0 %2037  ;;  %v2035_v22 = vpop.xlane.xlu1 %2034 }
 0xe0b   : > { %v2044_v23 = vsub.f32 %v1975_v0, %v2038_v21  ;;  %v2043_v24 = vsub.f32 %v1926_v60, %v2035_v22  ;;  %v2881_v22 = vld [vmem:[%s4187_s4 + $0x1c] sm:$0xf] }
 0xe0d   : > { %v2050_v25 = vmul.f32 1.442695, %v2044_v23  ;;  %v2048_v26 = vmul.f32 1.442695, %v2043_v24 }
 0xe0e   : > { %v2079_v53 = vpop.permute.xlu1 %2078 }
 0xe0f   : > { %3420 = vpow2.f32 %v2050_v25  ;;  %v2084_v27 = vsel %vm964_vm5, %v2079_v53, 0 }
 0xe10   : > { %3422 = vpow2.f32 %v2048_v26  ;;  %3234 = vmatpush3.bf16.msra.mxu1 %v2084_v27  ;;  %v2416_v27 = vsel %vm964_vm5, %v2881_v22, 0 }
 0xe11   : > { %3245 = vmatprep.subr.bf16.mxu1 %v3508_v2 }
 0xe12   : > { %v2041_v30 = vpop.xlane.xlu0 %2040 }
 0xe13   : > { %v2045_v18 = vsub.f32 %v2024_v11, %v2041_v30  ;;  %v2879_v11 = vld [vmem:[%s4187_s4 + $0x14] sm:$0xf] }
 0xe14   : > { %v3419_v31 = vpop.eup %3418  ;;  %v2324_v12 = vsel %vm964_vm5, %v2879_v11, 0 }
 0xe15   : > { %v2052_v32 = vmul.f32 1.442695, %v2045_v18  ;;  %v2054_v35 = vsel %vm717_vm4, %v3419_v31, 0.0 }
 0xe16   : > { %2055 = vadd.xlane.f32.xlu1 %v2054_v35 }
 0xe17   : > { %3424 = vpow2.f32 %v2052_v32 }
 0xe1c   : > { %v3421_v16 = vpop.eup %3420 }
 0xe1d   : > { %v3423_v38 = vpop.eup %3422  ;;  %v2060_v41 = vsel %vm717_vm4, %v3421_v16, 0.0 }
 0xe1e   : > { %2061 = vadd.xlane.f32.xlu1 %v2060_v41  ;;  %v2057_v43 = vsel %vm717_vm4, %v3423_v38, 0.0 }
 0xe1f   : > { %2058 = vadd.xlane.f32.xlu0 %v2057_v43 }
 0xe24   : > { %v3425_v44 = vpop.eup %3424 }
 0xe25   : > { %v2063_v45 = vsel %vm717_vm4, %v3425_v44, 0.0 }
 0xe26   : > { %2064 = vadd.xlane.f32.xlu0 %v2063_v45 }
 0xe2f   : > { %2174 = vrot.lane.b32.xlu1 %v3962_v54, %s3513_s15 }
 0xe33   : > { %2222 = vrot.lane.b32.xlu1 %v3971_v39, %s3513_s15 }
 0xe3c   : > { %2126 = vrot.lane.b32.xlu0 %v3966_v28, %s3513_s15 }
 0xe9f   : > { %v2056_v46 = vpop.xlane.xlu1 %2055 }
 0xea0   : > { %3426 = vrcp.f32 %v2056_v46 }
 0xea7   : > { %v2062_v47 = vpop.xlane.xlu1 %2061 }
 0xea8   : > { %3428 = vrcp.f32 %v2062_v47  ;;  %v2059_v48 = vpop.xlane.xlu0 %2058 }
 0xea9   : > { %3430 = vrcp.f32 %v2059_v48 }
 0xeab   : > { %v2175_v52 = vpop.permute.xlu1 %2174 }
 0xeac   : > { %v2180_v54 = vsel %vm964_vm5, %v2175_v52, 0 }
 0xead   : > { %v3427_v49 = vpop.eup %3426 }
 0xeae   : > { %v2070_v50 = vmul.f32 %v3427_v49, %v3419_v31 }
 0xeaf   : > { %v2065_v55 = vpop.xlane.xlu0 %2064  ;;  %v2223_v0 = vpop.permute.xlu1 %2222 }
 0xeb0   : > { %3432 = vrcp.f32 %v2065_v55  ;;  %v2074_v56 = vpack.c.bf16 %v2070_v50, %v2070_v50  ;;  %v2228_v5 = vsel %vm964_vm5, %v2223_v0, 0 }
 0xeb2   : > { %3236 = vmatmul.mubr.msk.bf16.vlgmr.msra.gmra.mxu1 %vm717_vm4, %v2074_v56 }
 0xeb3   : > { %3246 = vmatpush3.bf16.msra.mxu1 %v2180_v54  ;;  %v2127_v39 = vpop.permute.xlu0 %2126  ;;  %3247 = vmatprep.mubr.msk.bf16.mxu1 %vm3509_vm0, %v3508_v2 }
 0xeb4   : > { %v2132_v28 = vsel %vm964_vm5, %v2127_v39, 0  ;;  %3257 = vmatprep.subr.bf16.mxu1 %v3508_v2 }
 0xeb5   : > { %v3429_v57 = vpop.eup %3428  ;;  %3240 = vmatpush3.bf16.msra.mxu0 %v2132_v28 }
 0xeb6   : > { %v3431_v58 = vpop.eup %3430  ;;  %3251 = vmatprep.subr.bf16.mxu0 %v3508_v2  ;;  %v2072_v59 = vmul.f32 %v3429_v57, %v3421_v16 }
 0xeb7   : > { %v2071_v60 = vmul.f32 %v3431_v58, %v3423_v38 }
 0xeb8   : > { %v2076_v1 = vpack.c.bf16 %v2072_v59, %v2072_v59 }
 0xeb9   : > { %v2075_v3 = vpack.c.bf16 %v2071_v60, %v2071_v60 }
 0xeba   : > { %3248 = vmatmul.mubr.msk.bf16.vlgmr.msra.gmra.mxu1 %vm717_vm4, %v2076_v1 }
 0xebb   : > { %3242 = vmatmul.mubr.msk.bf16.vlgmr.msra.gmra.mxu0 %vm717_vm4, %v2075_v3  ;;  %3259 = vmatprep.mubr.msk.bf16.mxu1 %vm3509_vm0, %v3508_v2  ;;  %v2468_v3 = vrot.slane %v3949_v4, %v1349_v29  ;;  %v3386_v29 = vld [vmem:[%s4188_s5 + $0x38] sm:$0xff]  }
 0xebc   : > { %3252 = vmatpush3.bf16.msra.mxu0 %v2228_v5  ;;  %3253 = vmatprep.mubr.msk.bf16.mxu0 %vm3509_vm0, %v3508_v2 }
 0xebd   : > { %v3433_v6 = vpop.eup %3432  ;;  %3263 = vmatprep.subr.bf16.mxu0 %v3508_v2  ;;  %3258 = vmatpush3.bf16.msra.mxu1 %v2278_v10 }
 0xebe   : > { %v2073_v7 = vmul.f32 %v3433_v6, %v3425_v44  ;;  %3269 = vmatprep.subr.bf16.mxu1 %v3508_v2 }
 0xec0   : > { %v2077_v8 = vpack.c.bf16 %v2073_v7, %v2073_v7 }
 0xec3   : > { %3254 = vmatmul.mubr.msk.bf16.vlgmr.msra.gmra.mxu0 %vm717_vm4, %v2077_v8 }
 0xec4   : > { %3265 = vmatprep.mubr.msk.bf16.mxu0 %vm3509_vm0, %v3508_v2  ;;  %3264 = vmatpush3.bf16.msra.mxu0 %v2324_v12 }
 0xec5   : > { %3275 = vmatprep.subr.bf16.mxu0 %v3508_v2 }
 0xf72   : > { %v2120_v14 = vpop.f32.mrf.mxu1 }
 0xf73   : > { %v2270_v15 = vpack.c.bf16 %v2120_v14, %v2120_v14 }
 0xf74   : > { %v3237_v19 = vpop.f32.mrf.mxu1 }
 0xf75   : > { %3260 = vmatmul.mubr.msk.bf16.vlgmr.msra.gmra.mxu1 %vm717_vm4, %v2270_v15 }
 0xf76   : > { %v2123_v20 = vpop.f32.mrf.mxu1  ;;  %3270 = vmatpush3.bf16.msra.mxu1 %v2370_v17  ;;  %3271 = vmatprep.mubr.msk.bf16.mxu1 %vm3509_vm0, %v3508_v2 }
 0xf77   : > { %3281 = vmatprep.subr.bf16.mxu1 %v3508_v2  ;;  %v3387_v20 = vld [vmem:[%s4188_s5 + $0x30] sm:$0xff]  }
 0xf78   : > { %v3238_v21 = vpop.f32.mrf.mxu1 }
 0xf7a   : > { %v2216_v23 = vpop.f32.mrf.mxu1 }
 0xf7b   : > { %v2168_v24 = vpop.f32.mrf.mxu0  ;;  %v2272_v25 = vpack.c.bf16 %v2216_v23, %v2216_v23  ;;  %v2487_v23 = vrot.slane %v3949_v4, %v1368_v61  ;;  %v3389_v61 = vld [vmem:[%s4188_s5 + $0x50] sm:$0xff]  }
 0xf7c   : > { %v2271_v26 = vpack.c.bf16 %v2168_v24, %v2168_v24  ;;  %v3249_v53 = vpop.f32.mrf.mxu1 }
 0xf7d   : > { %v3243_v30 = vpop.f32.mrf.mxu0  ;;  %3272 = vmatmul.mubr.msk.bf16.vlgmr.msra.gmra.mxu1 %vm717_vm4, %v2272_v25 }
 0xf7e   : > { %3266 = vmatmul.mubr.msk.bf16.vlgmr.msra.gmra.mxu0 %vm717_vm4, %v2271_v26  ;;  %v2219_v18 = vpop.f32.mrf.mxu1  ;;  %3285 = vmatprep.mubr.msk.bf16.mxu1 %vm3509_vm0, %v3508_v2  ;;  %v2492_v26 = vrot.slane %v3949_v4, %v1373_v62  ;;  %v3390_v62 = vld [vmem:[%s4188_s5 + $0x48] sm:$0xff]  }
 0xf7f   : > { %v2171_v31 = vpop.f32.mrf.mxu0  ;;  %3276 = vmatpush3.bf16.msra.mxu0 %v2416_v27  ;;  %3277 = vmatprep.mubr.msk.bf16.mxu0 %vm3509_vm0, %v3508_v2  ;;  %v3388_v18 = vld [vmem:[%s4188_s5 + $0x58] sm:$0xff]  }
 0xf80   : > { %v3250_v32 = vpop.f32.mrf.mxu1  ;;  %3289 = vmatprep.subr.bf16.mxu0 %v3508_v2  ;;  %3282 = vmatpush3.bf16.msra.mxu1 %v3386_v29  ;;  %v3391_v31 = vld [vmem:[%s4188_s5 + $0x40] sm:$0xff]  }
 0xf81   : > { %v3244_v35 = vpop.f32.mrf.mxu0  ;;  %3283 = vmatprep.subr.bf16.mxu1 %v3508_v2  ;;  %v2498_v32 = vrot.slane %v3949_v4, %v1379_v63  ;;  %v2563_v63 = vrot.slane %v278_v33, %v3664_v34  ;;  %v2648_v34 = vrot.slane %v278_v33, %v3670_v36  ;;  %v3392_v36 = vld [vmem:[%s4189_s6 + $0x8] sm:$0xff]  }
 0xf83   : > { %v2264_v16 = vpop.f32.mrf.mxu0 }
 0xf84   : > { %v2273_v38 = vpack.c.bf16 %v2264_v16, %v2264_v16  ;;  %3284 = vmatpush3.bf16.msra.mxu1 %v3387_v20 }
 0xf85   : > { %v3255_v41 = vpop.f32.mrf.mxu0  ;;  %3301 = vmatprep.subr.bf16.mxu1 %v3508_v2 }
 0xf86   : > { %3278 = vmatmul.mubr.msk.bf16.vlgmr.msra.gmra.mxu0 %vm717_vm4, %v2273_v38 }
 0xf87   : > { %v2267_v43 = vpop.f32.mrf.mxu0  ;;  %3297 = vmatprep.mubr.msk.bf16.mxu0 %vm3509_vm0, %v3508_v2  ;;  %3290 = vmatpush3.bf16.msra.mxu0 %v3388_v18 }
 0xf88   : > { %3291 = vmatprep.subr.bf16.mxu0 %v3508_v2 }
 0xf89   : > { %v3256_v44 = vpop.f32.mrf.mxu0 }
 0xf8b   : > { %3292 = vmatpush3.bf16.msra.mxu0 %v3389_v61 }
 0xf8c   : > { %3293 = vmatprep.subr.bf16.mxu0 %v3508_v2 }
 0xf8f   : > { %3294 = vmatpush3.bf16.msra.mxu0 %v3390_v62 }
 0xf90   : > { %3295 = vmatprep.subr.bf16.mxu0 %v3508_v2 }
 0xf93   : > { %3296 = vmatpush3.bf16.msra.mxu0 %v3391_v31 }
0x1035   : > { %v2314_v45 = vpop.f32.mrf.mxu1 }
0x1036   : > { %v2458_v54 = vsel %vm396_vm3, %v2314_v45, 0.0 }
0x1037   : > { %v3261_v46 = vpop.f32.mrf.mxu1 }
0x1039   : > { %v2317_v47 = vpop.f32.mrf.mxu1 }
0x103b   : > { %v3262_v48 = vpop.f32.mrf.mxu1 }
0x103d   : > { %v2406_v49 = vpop.f32.mrf.mxu1 }
0x103e   : > { %v2360_v50 = vpop.f32.mrf.mxu0  ;;  %v2461_v60 = vsel %vm396_vm3, %v2406_v49, 0.0 }
0x103f   : > { %v2459_v52 = vsel %vm396_vm3, %v2360_v50, 0.0  ;;  %v3273_v55 = vpop.f32.mrf.mxu1 }
0x1040   : > { %v3267_v56 = vpop.f32.mrf.mxu0  ;;  %v2460_v28 = vadd.f32 %v2459_v52, %v2458_v54 }
0x1041   : > { %v2409_v39 = vpop.f32.mrf.mxu1 }
0x1042   : > { %v2363_v57 = vpop.f32.mrf.mxu0  ;;  %v2462_v0 = vadd.f32 %v2461_v60, %v2460_v28 }
0x1043   : > { %v3274_v58 = vpop.f32.mrf.mxu1 }
0x1044   : > { %v3268_v59 = vpop.f32.mrf.mxu0 }
0x1046   : > { %v2452_v1 = vpop.f32.mrf.mxu0 }
0x1047   : > { %v2463_v5 = vsel %vm396_vm3, %v2452_v1, 0.0 }
0x1048   : > { %v2464_v6 = vadd.f32 %v2463_v5, %v2462_v0  ;;  %v3279_v7 = vpop.f32.mrf.mxu0 }
0x1049   : > { %v2653_v7 = vrot.slane %v278_v33, %v3910_v51 }
0x104a   : > { %v2469_v8 = vadd.f32 %v2468_v3, %v2464_v6  ;;  %v2455_v9 = vpop.f32.mrf.mxu0 }
0x104c   : > { %v3280_v10 = vpop.f32.mrf.mxu0  ;;  %v2470_v11 = vadd.f32 %v2469_v8, %v3914_v42 }
0x104e   : > { %v2471_v12 = vsel %vm396_vm3, %v2470_v11, 0.0 }
0x104f   : > { %2472 = vadd.xlane.f32.xlu0 %v2471_v12 }
0x10d8   : > { %v2473_v13 = vpop.xlane.xlu0 %2472 }
0x10d9   : > { %v2474_v14 = vmul.f32 0.03125, %v2473_v13 }
0x10db   : > { %v2475_v15 = vsub.f32 %v2470_v11, %v2474_v14 }
0x10dd   : > { %v2476_v17 = vmul.f32 %v2475_v15, %v2475_v15 }
0x10df   : > { %v2477_v19 = vsel %vm396_vm3, %v2476_v17, 0.0  ;;  %v3393_v17 = vld [vmem:[%s4189_s6] sm:$0xff]  }
0x10e0   : > { %2478 = vadd.xlane.f32.xlu1 %v2477_v19 }
0x1169   : > { %v2479_v42 = vpop.xlane.xlu1 %2478 }
0x116a   : > { %v2480_v21 = vmul.f32 0.03125, %v2479_v42 }
0x116c   : > { %v2481_v22 = vadd.f32 1e-12, %v2480_v21 }
0x116e   : > { %3434 = vrsqrt.f32 %v2481_v22 }
0x117b   : > { %v3435_v24 = vpop.eup %3434 }
0x117c   : > { %v2483_v25 = vmul.f32 %v3435_v24, %v2475_v15 }
0x117e   : > { %v2488_v53 = vmul.f32 %v2487_v23, %v2483_v25 }
0x1180   : > { %v2493_v27 = vadd.f32 %v2492_v26, %v2488_v53 }
0x1182   : > { %v2494_v30 = vpack.c.bf16 %v2493_v27, %v2493_v27 }
0x1184   : > { %3286 = vmatmul.mubr.msk.bf16.vlgmr.msra.gmra.mxu1 %vm396_vm3, %v2494_v30  ;;  %v3444_v30 = vld [vmem:[%s4184_s1 + $0x20] sm:$0xff] }
0x1185   : > { %3305 = vmatprep.mubr.msk.bf16.mxu1 %vm3509_vm0, %v3508_v2  ;;  %3302 = vmatpush3.bf16.msra.mxu1 %v3392_v36 }
0x1186   : > { %3303 = vmatprep.subr.bf16.mxu1 %v3508_v2 }
0x1189   : > { %3304 = vmatpush3.bf16.msra.mxu1 %v3393_v17 }
0x1244   : > { %v2548_v35 = vpop.f32.mrf.mxu1 }
0x1245   : > { %v2549_v16 = vadd.f32 %v2548_v35, %v2498_v32 }
0x1246   : > { %v3287_v38 = vpop.f32.mrf.mxu1 }
0x1247   : > { %v2555_v41 = vmul.f32 0.70710677, %v2549_v16  ;;  %v2554_v46 = vmul.f32 0.5, %v2549_v16 }
0x1248   : > { %v2551_v43 = vpop.f32.mrf.mxu1 }
0x1249   : > { %3436 = verf.f32 %v2555_v41 }
0x124a   : > { %v3288_v44 = vpop.f32.mrf.mxu1 }
0x1256   : > { %v3437_v45 = vpop.eup %3436 }
0x1257   : > { %v2557_v47 = vadd.f32 1.0, %v3437_v45 }
0x1259   : > { %v2558_v48 = vmul.f32 %v2557_v47, %v2554_v46 }
0x125b   : > { %v2559_v49 = vpack.c.bf16 %v2558_v48, %v2558_v48 }
0x125d   : > { %3298 = vmatmul.mubr.msk.bf16.vlgmr.msra.gmra.mxu0 %vm1470_vm6, %v2559_v49 }
0x131d   : > { %v2625_v4 = vpop.f32.mrf.mxu0 }
0x131e   : > { %v2626_v50 = vadd.f32 %v2625_v4, %v2563_v63 }
0x131f   : > { %v3299_v52 = vpop.f32.mrf.mxu0 }
0x1320   : > { %v2631_v55 = vadd.f32 %v2626_v50, %v2493_v27 }
0x1321   : > { %v2628_v56 = vpop.f32.mrf.mxu0 }
0x1322   : > { %v2632_v54 = vsel %vm396_vm3, %v2631_v55, 0.0 }
0x1323   : > { %2633 = vadd.xlane.f32.xlu0 %v2632_v54  ;;  %v3300_v39 = vpop.f32.mrf.mxu0 }
0x13ac   : > { %v2634_v28 = vpop.xlane.xlu0 %2633 }
0x13ad   : > { %v2635_v57 = vmul.f32 0.03125, %v2634_v28 }
0x13af   : > { %v2636_v58 = vsub.f32 %v2631_v55, %v2635_v57 }
0x13b1   : > { %v2637_v59 = vmul.f32 %v2636_v58, %v2636_v58 }
0x13b3   : > { %v2638_v60 = vsel %vm396_vm3, %v2637_v59, 0.0 }
0x13b4   : > { %2639 = vadd.xlane.f32.xlu0 %v2638_v60 }
0x143d   : > { %v2640_v0 = vpop.xlane.xlu0 %2639 }
0x143e   : > { %v2641_v1 = vmul.f32 0.03125, %v2640_v0 }
0x1440   : > { %v2642_v3 = vadd.f32 1e-12, %v2641_v1 }
0x1442   : > { %3438 = vrsqrt.f32 %v2642_v3 }
0x144f   : > { %v3439_v5 = vpop.eup %3438 }
0x1450   : > { %v2644_v6 = vmul.f32 %v3439_v5, %v2636_v58 }
0x1452   : > { %v2649_v8 = vmul.f32 %v2648_v34, %v2644_v6 }
0x1454   : > { %v2654_v9 = vadd.f32 %v2653_v7, %v2649_v8 }
0x1456   : > { %v2655_v10 = vsel %vm396_vm3, %v2654_v9, 0.0 }
0x1457   : > { %2656 = vadd.xlane.f32.xlu1 %v2655_v10 }
0x14e0   : > { %v2657_v11 = vpop.xlane.xlu1 %2656 }
0x14e1   : > { %v2658_v12 = vmul.f32 0.03125, %v2657_v11 }
0x14e3   : > { %v2659_v13 = vsub.f32 %v2654_v9, %v2658_v12 }
0x14e5   : > { %v2660_v14 = vmul.f32 %v2659_v13, %v2659_v13 }
0x14e7   : > { %v2661_v15 = vsel %vm396_vm3, %v2660_v14, 0.0 }
0x14e8   : > { %2662 = vadd.xlane.f32.xlu0 %v2661_v15 }
0x1571   : > { %v2663_v19 = vpop.xlane.xlu0 %2662 }
0x1572   : > { %v2664_v29 = vmul.f32 0.03125, %v2663_v19 }
0x1574   : > { %v2665_v20 = vadd.f32 1e-12, %v2664_v29 }
0x1576   : > { %3440 = vrsqrt.f32 %v2665_v20 }
0x1583   : > { %v3441_v42 = vpop.eup %3440 }
0x1584   : > { %v2667_v21 = vmul.f32 %v3441_v42, %v2659_v13 }
0x1586   : > { %v2668_v22 = vmul.f32 %v2667_v21, %v3673_v37  ;;  %v2683_v37 = vrot.slane %v3444_v30, %v3910_v51 }
0x1588   : > { %v2669_v23 = vadd.f32 %v2668_v22, %v3676_v40 }
0x158a   : > { %v2671_v24 = vmul.f32 0.70710677, %v2669_v23  ;;  %v2670_v26 = vmul.f32 0.5, %v2669_v23 }
0x158c   : > { %3442 = verf.f32 %v2671_v24 }
0x1599   : > { %v3443_v25 = vpop.eup %3442 }
0x159a   : > { %v2673_v53 = vadd.f32 1.0, %v3443_v25 }
0x159c   : > { %v2674_v27 = vmul.f32 %v2673_v53, %v2670_v26 }
0x159e   : > { %v2675_v2 = vpack.c.bf16 %v2674_v27, %v2674_v27 }
0x15a0   : > { %3306 = vmatmul.mubr.msk.bf16.vlgmr.msra.gmra.mxu1 %vm396_vm3, %v2675_v2 }
0x1660   : > { %v2733_v40 = vpop.f32.mrf.mxu1 }
0x1661   : > { %v2734_v18 = vadd.f32 %v2733_v40, %v2683_v37 }
0x1662   : > { %v3307_v61 = vpop.f32.mrf.mxu1 }
0x1663   : > { %2739 = vst [vmem:[%s269_s21] sm:$0xff] %v2734_v18 }
0x1664   : > { %v2736_v62 = vpop.f32.mrf.mxu1 }
0x1665   : > { %3458 = shalt.err (!%p3455_p3)
}
0x1666   : > { %s3459_s19 = scalar_lea.hbm %s4142_s8, 128  ;;  %s3463_s15 = scalar_lea.hbm %s4190_s7, 256 }
0x1667   : > { %p3460_p4 = scmp.ne.s32.totalorder %s4142_s8, %s3459_s19  ;;  %p3464_p9 = scmp.lt.s32.totalorder %s4142_s8, %s4190_s7 }
0x1668   : > { %p3465_p10 = scmp.lt.s32.totalorder %s3463_s15, %s3459_s19 }
0x1669   : > { %p3461_p7 = pnand %p3460_p4, %p3593_p5 }
0x166a   : > { %p3466_p11 = por %p3465_p10, %p3464_p9 }
0x166b   : > { %p3462_p8 = pneg %p3461_p7 }
0x166d   : > { %p3467_p12 = pnand %p3466_p11, %p3462_p8 }
0x166f   : > { %3470 = shalt.err (!%p3467_p12)
}
0x1670   : > { %3309 = dma.vmem_to_hbm [thread:$0]  (%p3593_p5), %s4144_s22, 128, %s4142_s8, %s2741_s9   ;;  %v3308_v51 = vpop.f32.mrf.mxu1 }
0x1671 PF: > { %p3315_p13 = scmp.ge.s32.totalorder %s3505_s27, 2  ;;  %s2766_s23 = sand.u32 1, %s3493_s24  }
0x1672   : > { %s2767_s29 = scalar_lea.sflag [#allocation3], %s2766_s23 }
0x1673   : > { %p3312_p0 = pnand %p3315_p13, %p3597_p6 }
0x1675   : > { %p3313_p1 = pneg %p3312_p0 }
0x1677   : > { %3488 = dma.done.wait (%p3313_p1), %s2767_s29, 128  }
0x1678   : > { %3490 = vsyncadd (%p3313_p1), %s2767_s29, 4294967168  ;;  %p17_p2 = scmp.ge.s32.totalorder %s3580_s30, 4   ;;  %s4193_s24 = smov %s3497_s25 }
0x1679   : > { %s4194_s25 = smov %s3501_s26  ;;  %s4195_s26 = smov %s3591_s10 }
0x167a   : > { %s4196_s27 = smov %s3580_s30  ;;  %19 = sbr.rel (!%p17_p2) target bundleno = 3 (0x3), region = 86 }
0x167f   :  { %2772 = vsyncpa [#allocation3], 1 }
0x1680   :  { %2774 = vsyncpa [#allocation3 + $0x1], 1 }

</bundles_post_ra>
